<compile_context>
chip_gen: v7x
topology: tpu7x:2x2x1
jax: 0.10.0
libtpu: 0.0.40
codegen_flags: <defaults>
</compile_context>

<pallas_src>
import functools

import jax
import jax.numpy as jnp
from jax import lax
from jax.experimental import pallas as pl
from jax.experimental.pallas import tpu as pltpu

_LANE = 128     # lane granularity (last dim)
_SUBLANE = 8    # sublane granularity (second-to-last dim)


def _round_up(x, m):
    return (x + m - 1) // m * m


def _sigmoid1(v):
    # logistic(x) == 0.5*(tanh(x/2)+1): guarantees a single EUP transcendental
    # per gate instead of a possible exp + divide lowering.
    return 0.5 * (jnp.tanh(0.5 * v) + 1.0)


def _lstm_chunk_kernel(x_ref, bias_ref, wih_hbm, whh_hbm, out_ref,
                       wih_scr, whh_scr, gx_scr, h_scr, c_scr, dma_sems,
                       *, unroll):
    """Runs one chunk of t_chunk LSTM time steps.

    x_ref    : (T, Bp, Ip)  bf16  input block for this chunk
    bias_ref : (1, 4*Hp)    f32   b_ih + b_hh, gate-major columns
    wih_hbm  : (Ip, 4*Hp)   bf16  input weight, left in place (pl.ANY)
    whh_hbm  : (Hp, 4*Hp)   bf16  recurrent weight, left in place (pl.ANY)
    out_ref  : (T, Bp, Hp)  f32   hidden states for this chunk
    wih_scr / whh_scr : resident single-buffered VMEM copies of the weights
    gx_scr   : (T*Bp, 4*Hp) f32   per-chunk gate pre-activations
    h_scr / c_scr : (Bp, Hp) f32  recurrent state carried across grid steps
    dma_sems : (2,) DMA semaphores for the one-shot weight copies
    """
    tc, bp, ip = x_ref.shape
    hp = h_scr.shape[-1]

    @pl.when(pl.program_id(0) == 0)
    def _init():
        # One-shot copy of the grid-invariant weights into VMEM scratch:
        # guaranteed single-buffered residency (no double-buffered BlockSpec).
        cp_wih = pltpu.make_async_copy(wih_hbm, wih_scr, dma_sems.at[0])
        cp_whh = pltpu.make_async_copy(whh_hbm, whh_scr, dma_sems.at[1])
        cp_wih.start()
        cp_whh.start()
        cp_wih.wait()
        cp_whh.wait()
        h_scr[...] = jnp.zeros_like(h_scr)   # h_0 = 0 (as in the PyTorch module)
        c_scr[...] = jnp.zeros_like(c_scr)   # c_0 = 0

    # ---- Time-parallel input projection for the whole chunk -----------------
    # (T*Bp, Ip) @ (Ip, 4*Hp), bf16 operands, f32 accumulation.  This is off the
    # serial h-dependency chain, so it fills the MXU and pipelines under the
    # recurrence; it replaces the old HBM-resident precomputed gates_x stream.
    xb = x_ref[...].reshape(tc * bp, ip)
    gx = jnp.dot(xb, wih_scr[...], preferred_element_type=jnp.float32)
    gx_scr[...] = gx + bias_ref[...]

    w = whh_scr[...]   # hoisted load of the resident bf16 recurrent weight

    def step(t, carry):
        h = h_scr[...]
        c = c_scr[...]
        row0 = pl.multiple_of(t * bp, bp)
        gates = gx_scr[pl.ds(row0, bp), :] + jnp.dot(
            h.astype(w.dtype), w, preferred_element_type=jnp.float32)
        # PyTorch gate order [i | f | g | o]; each gate block is hp lanes wide.
        i_g = _sigmoid1(gates[:, 0 * hp:1 * hp])
        f_g = _sigmoid1(gates[:, 1 * hp:2 * hp])
        g_g = jnp.tanh(gates[:, 2 * hp:3 * hp])
        o_g = _sigmoid1(gates[:, 3 * hp:4 * hp])
        c_new = f_g * c + i_g * g_g
        h_new = o_g * jnp.tanh(c_new)
        h_scr[...] = h_new
        c_scr[...] = c_new
        out_ref[t] = h_new.astype(out_ref.dtype)
        return carry

    # Partial unroll: enough LLO visibility to overlap MXU/EUP/VPU work per
    # step without bloating code size / vreg pressure at large t_chunk.
    lax.fori_loop(0, tc, step, 0, unroll=unroll)


def lstm_forward(x, w_ih, w_hh, b_ih, b_hh, *, t_chunk=32, unroll=8):
    """Single-layer LSTM forward; returns the full hidden sequence `ula`.

    x: (S, B, I) float32 (seq, batch, input), batch_first=False.  Weights use
    PyTorch nn.LSTM conventions: w_ih (4H, I), w_hh (4H, H), b_ih/b_hh (4H,),
    gate order [i|f|g|o].  Returns (S, B, H) float32.
    """
    S, B, I = x.shape
    H = w_ih.shape[0] // 4
    assert w_ih.shape == (4 * H, I)
    assert w_hh.shape == (4 * H, H)

    f32, bf16 = jnp.float32, jnp.bfloat16

    Hp = _round_up(H, _LANE)      # lane-align hidden (and each gate block)
    Bp = _round_up(B, _SUBLANE)   # sublane-align batch
    Ip = _round_up(I, _SUBLANE)   # sublane-align w_ih's contraction dim
    t_chunk = max(1, min(t_chunk, S))
    Sp = _round_up(S, t_chunk)    # tail chunk handled by zero-padding time
    unroll = max(1, min(unroll, t_chunk))
    gw = 4 * Hp

    # ---- Operand layout (all padding is exact zero-padding) -----------------
    # Gate-major columns: col = gate * Hp + unit.  Padding safety invariant:
    # padded h/c lanes stay 0 for all t because the padded columns of
    # w_ih/w_hh/bias are 0 (so those gates see a 0 pre-activation and c stays
    # 0) and the padded *rows* of w_hh are 0 (so padded lanes never leak into
    # real lanes).  Padded batch rows and padded time steps are sliced off.
    def to_gate_cols(w, in_dim, in_pad):
        w4 = jnp.transpose(w.reshape(4, H, in_dim), (2, 0, 1))   # (in, gate, out)
        w4 = jnp.pad(w4, ((0, in_pad - in_dim), (0, 0), (0, Hp - H)))
        return w4.reshape(in_pad, gw)

    wih_p = to_gate_cols(w_ih.astype(f32), I, Ip).astype(bf16)   # (Ip, 4Hp)
    whh_p = to_gate_cols(w_hh.astype(f32), H, Hp).astype(bf16)   # (Hp, 4Hp)
    bias_p = jnp.pad((b_ih + b_hh).astype(f32).reshape(4, H),
                     ((0, 0), (0, Hp - H))).reshape(1, gw)

    # bf16 input stream (halves the HBM read); accumulation stays f32.
    x_p = jnp.pad(x.astype(f32),
                  ((0, Sp - S), (0, Bp - B), (0, Ip - I))).astype(bf16)

    # ---- Explicit VMEM budget (residents + double-buffered streams) ---------
    vmem_need = (
        Hp * gw * 2                      # resident w_hh (bf16, single copy)
        + Ip * gw * 2                    # resident w_ih (bf16, single copy)
        + t_chunk * Bp * gw * 4          # gate pre-activation scratch (f32)
        + 2 * Bp * Hp * 4                # h / c state (f32)
        + 2 * t_chunk * Bp * Ip * 2      # double-buffered x blocks (bf16)
        + 2 * t_chunk * Bp * Hp * 4      # double-buffered out blocks (f32)
        + 2 * gw * 4                     # double-buffered bias block (f32)
    )
    kind = jax.devices()[0].device_kind.lower()
    # ~56 MiB is safe on v7x (64 MiB physical VMEM); v5e/v6e have 128 MiB.
    cap = (100 << 20) if ("v5" in kind or "v6" in kind) else (56 << 20)
    vmem_limit = int(min(max(2 * vmem_need, 32 << 20), cap))

    grid_spec = pltpu.PrefetchScalarGridSpec(
        num_scalar_prefetch=0,
        grid=(Sp // t_chunk,),
        in_specs=[
            pl.BlockSpec((t_chunk, Bp, Ip), lambda i: (i, 0, 0)),   # x chunk
            pl.BlockSpec((1, gw), lambda i: (0, 0)),                # bias
            pl.BlockSpec(memory_space=pl.ANY),                      # w_ih (HBM)
            pl.BlockSpec(memory_space=pl.ANY),                      # w_hh (HBM)
        ],
        out_specs=pl.BlockSpec((t_chunk, Bp, Hp), lambda i: (i, 0, 0)),
        scratch_shapes=[
            pltpu.VMEM((Ip, gw), bf16),              # resident w_ih
            pltpu.VMEM((Hp, gw), bf16),              # resident w_hh
            pltpu.VMEM((t_chunk * Bp, gw), f32),     # chunk gate pre-activations
            pltpu.VMEM((Bp, Hp), f32),               # h state
            pltpu.VMEM((Bp, Hp), f32),               # c state
            pltpu.SemaphoreType.DMA((2,)),           # one-shot weight copies
        ],
    )

    out = pl.pallas_call(
        functools.partial(_lstm_chunk_kernel, unroll=unroll),
        out_shape=jax.ShapeDtypeStruct((Sp, Bp, Hp), f32),
        grid_spec=grid_spec,
        compiler_params=pltpu.CompilerParams(
            # Time axis is an inherently sequential recurrence.
            # (On v7x with B >= 16 one could add a leading "parallel" batch
            #  axis to use both TensorCores; not worthwhile at B=2.)
            dimension_semantics=("arbitrary",),
            vmem_limit_bytes=vmem_limit,
        ),
    )(x_p, bias_p, wih_p, whh_p)

    return out[:S, :B, :H]


# ---------------------------- references -------------------------------------

def lstm_reference_f32(x, w_ih, w_hh, b_ih, b_hh):
    """Pure-JAX f32 / HIGHEST-precision reference of the nn.LSTM equations."""
    H = w_hh.shape[1]
    b = (b_ih + b_hh).astype(jnp.float32)
    hi = lax.Precision.HIGHEST

    def step(carry, x_t):
        h, c = carry
        gates = (jnp.dot(x_t, w_ih.T, precision=hi)
                 + jnp.dot(h, w_hh.T, precision=hi) + b)
        i_g = jax.nn.sigmoid(gates[:, 0 * H:1 * H])
        f_g = jax.nn.sigmoid(gates[:, 1 * H:2 * H])
        g_g = jnp.tanh(gates[:, 2 * H:3 * H])
        o_g = jax.nn.sigmoid(gates[:, 3 * H:4 * H])
        c_new = f_g * c + i_g * g_g
        h_new = o_g * jnp.tanh(c_new)
        return (h_new, c_new), h_new

    B = x.shape[1]
    h0 = jnp.zeros((B, H), jnp.float32)
    c0 = jnp.zeros((B, H), jnp.float32)
    _, ula = lax.scan(step, (h0, c0), x.astype(jnp.float32))
    return ula


def lstm_reference_matched(x, w_ih, w_hh, b_ih, b_hh):
    """Reference with the kernel's numerics (bf16 matmul operands, f32
    accumulation, f32 gate math, tanh-based sigmoid) for a tight check that is
    independent of the deliberate bf16 quantization."""
    H = w_hh.shape[1]
    wih_t = w_ih.astype(jnp.bfloat16).T
    whh_t = w_hh.astype(jnp.bfloat16).T
    b = (b_ih + b_hh).astype(jnp.float32)

    def step(carry, x_t):
        h, c = carry
        gx = jnp.dot(x_t, wih_t, preferred_element_type=jnp.float32) + b
        gates = gx + jnp.dot(h.astype(jnp.bfloat16), whh_t,
                             preferred_element_type=jnp.float32)
        i_g = _sigmoid1(gates[:, 0 * H:1 * H])
        f_g = _sigmoid1(gates[:, 1 * H:2 * H])
        g_g = jnp.tanh(gates[:, 2 * H:3 * H])
        o_g = _sigmoid1(gates[:, 3 * H:4 * H])
        c_new = f_g * c + i_g * g_g
        h_new = o_g * jnp.tanh(c_new)
        return (h_new, c_new), h_new

    B = x.shape[1]
    h0 = jnp.zeros((B, H), jnp.float32)
    c0 = jnp.zeros((B, H), jnp.float32)
    _, ula = lax.scan(step, (h0, c0), x.astype(jnp.bfloat16))
    return ula


if __name__ == "__main__":
    # Small shapes consistent with the module: input_size=32 as in the spec,
    # a small lane-aligned hidden size instead of 10*13*13*13, short sequence.
    SEQ, BATCH, INPUT, HIDDEN = 12, 2, 32, 128

    key = jax.random.PRNGKey(0)
    kx, k1, k2, k3, k4 = jax.random.split(key, 5)

    bound = 1.0 / (HIDDEN ** 0.5)   # PyTorch nn.LSTM init range
    x = jax.random.normal(kx, (SEQ, BATCH, INPUT), dtype=jnp.float32)
    w_ih = jax.random.uniform(k1, (4 * HIDDEN, INPUT), jnp.float32, -bound, bound)
    w_hh = jax.random.uniform(k2, (4 * HIDDEN, HIDDEN), jnp.float32, -bound, bound)
    b_ih = jax.random.uniform(k3, (4 * HIDDEN,), jnp.float32, -bound, bound)
    b_hh = jax.random.uniform(k4, (4 * HIDDEN,), jnp.float32, -bound, bound)

    # t_chunk=8 with SEQ=12 exercises the tail-padding path and a 2-step grid
    # (recurrent state carried across grid iterations).
    ula = lstm_forward(x, w_ih, w_hh, b_ih, b_hh, t_chunk=8, unroll=8)
    jax.block_until_ready(ula)
    assert ula.shape == (SEQ, BATCH, HIDDEN)

    # (1) Tight check vs. a numerics-matched reference (validates the kernel
    #     itself, independent of the deliberate bf16 operand quantization).
    ref_m = lstm_reference_matched(x, w_ih, w_hh, b_ih, b_hh)
    err_m = float(jnp.max(jnp.abs(ula - ref_m)))
    assert jnp.allclose(ula, ref_m, atol=2e-3, rtol=2e-3), (
        f"mismatch vs matched-precision reference: max abs err = {err_m}")

    # (2) Loose check vs. the full-f32 HIGHEST reference (validates module
    #     semantics; tolerance deliberately widened for bf16 MXU operands,
    #     per the performance review).
    ref_f = lstm_reference_f32(x, w_ih, w_hh, b_ih, b_hh)
    err_f = float(jnp.max(jnp.abs(ula - ref_f)))
    assert jnp.allclose(ula, ref_f, atol=5e-2, rtol=5e-2), (
        f"mismatch vs f32 reference: max abs err = {err_f}")

    print("KERNEL_OK")
</pallas_src>

<mosaic_0001>
module attributes {stable_mosaic.version = 11 : i64} {
  func.func @_lstm_chunk_kernel(%arg0: i32, %arg1: memref<8x8x32xbf16, #tpu.memory_space<vmem>>, %arg2: memref<1x512xf32, #tpu.memory_space<vmem>>, %arg3: memref<32x512xbf16, #tpu.memory_space<any>>, %arg4: memref<128x512xbf16, #tpu.memory_space<any>>, %arg5: memref<8x8x128xf32, #tpu.memory_space<vmem>>, %arg6: memref<32x512xbf16, #tpu.memory_space<vmem>>, %arg7: memref<128x512xbf16, #tpu.memory_space<vmem>>, %arg8: memref<64x512xf32, #tpu.memory_space<vmem>>, %arg9: memref<8x128xf32, #tpu.memory_space<vmem>>, %arg10: memref<8x128xf32, #tpu.memory_space<vmem>>, %arg11: memref<2x!tpu.dma_semaphore, #tpu.memory_space<semaphore_mem>>) attributes {dimension_semantics = [#tpu.dimension_semantics<arbitrary>], iteration_bounds = array<i64: 2>, scalar_prefetch = 0 : i64, scratch_operands = 6 : i64, tpu.core_type = #tpu.core_type<tc>, window_params = [{transform_indices = @transform_0, window_bounds = array<i64: 8, 8, 32>}, {pipeline_mode = #tpu.pipeline_mode<synchronous>, transform_indices = @transform_1, window_bounds = array<i64: 1, 512>}, {}, {}, {transform_indices = @transform_4, window_bounds = array<i64: 8, 8, 128>}]} {
    %c0_i32 = arith.constant 0 : i32
    %0 = arith.cmpi eq, %arg0, %c0_i32 : i32
    %1 = arith.extui %0 : i1 to i32
    %c0_i32_0 = arith.constant 0 : i32
    %2 = arith.cmpi ne, %1, %c0_i32_0 : i32
    scf.if %2 {
      %c0_i32_188 = arith.constant 0 : i32
      %380 = tpu.memref_slice %arg11[%c0_i32_188] : memref<2x!tpu.dma_semaphore, #tpu.memory_space<semaphore_mem>> -> memref<1x!tpu.dma_semaphore, #tpu.memory_space<semaphore_mem>>
      %381 = tpu.memref_squeeze %380 : memref<1x!tpu.dma_semaphore, #tpu.memory_space<semaphore_mem>> -> memref<!tpu.dma_semaphore, #tpu.memory_space<semaphore_mem>>
      tpu.enqueue_dma source(%arg3 : memref<32x512xbf16, #tpu.memory_space<any>>) target(%arg6 : memref<32x512xbf16, #tpu.memory_space<vmem>>) target_semaphore(%381 : memref<!tpu.dma_semaphore, #tpu.memory_space<semaphore_mem>>)
      %c1_i32_189 = arith.constant 1 : i32
      %382 = tpu.memref_slice %arg11[%c1_i32_189] : memref<2x!tpu.dma_semaphore, #tpu.memory_space<semaphore_mem>> -> memref<1x!tpu.dma_semaphore, #tpu.memory_space<semaphore_mem>>
      %383 = tpu.memref_squeeze %382 : memref<1x!tpu.dma_semaphore, #tpu.memory_space<semaphore_mem>> -> memref<!tpu.dma_semaphore, #tpu.memory_space<semaphore_mem>>
      tpu.enqueue_dma source(%arg4 : memref<128x512xbf16, #tpu.memory_space<any>>) target(%arg7 : memref<128x512xbf16, #tpu.memory_space<vmem>>) target_semaphore(%383 : memref<!tpu.dma_semaphore, #tpu.memory_space<semaphore_mem>>)
      %c0_i32_190 = arith.constant 0 : i32
      %384 = tpu.memref_slice %arg11[%c0_i32_190] : memref<2x!tpu.dma_semaphore, #tpu.memory_space<semaphore_mem>> -> memref<1x!tpu.dma_semaphore, #tpu.memory_space<semaphore_mem>>
      %385 = tpu.memref_squeeze %384 : memref<1x!tpu.dma_semaphore, #tpu.memory_space<semaphore_mem>> -> memref<!tpu.dma_semaphore, #tpu.memory_space<semaphore_mem>>
      tpu.wait_dma2 semaphore(%385 : memref<!tpu.dma_semaphore, #tpu.memory_space<semaphore_mem>>) src(%arg3 : memref<32x512xbf16, #tpu.memory_space<any>>) dst(%arg6 : memref<32x512xbf16, #tpu.memory_space<vmem>>)
      %c1_i32_191 = arith.constant 1 : i32
      %386 = tpu.memref_slice %arg11[%c1_i32_191] : memref<2x!tpu.dma_semaphore, #tpu.memory_space<semaphore_mem>> -> memref<1x!tpu.dma_semaphore, #tpu.memory_space<semaphore_mem>>
      %387 = tpu.memref_squeeze %386 : memref<1x!tpu.dma_semaphore, #tpu.memory_space<semaphore_mem>> -> memref<!tpu.dma_semaphore, #tpu.memory_space<semaphore_mem>>
      tpu.wait_dma2 semaphore(%387 : memref<!tpu.dma_semaphore, #tpu.memory_space<semaphore_mem>>) src(%arg4 : memref<128x512xbf16, #tpu.memory_space<any>>) dst(%arg7 : memref<128x512xbf16, #tpu.memory_space<vmem>>)
      %cst_192 = arith.constant 0.000000e+00 : f32
      %388 = vector.broadcast %cst_192 : f32 to vector<8x128xf32>
      %c0_193 = arith.constant 0 : index
      %c0_194 = arith.constant 0 : index
      %389 = vector.load %arg9[%c0_193, %c0_194] : memref<8x128xf32, #tpu.memory_space<vmem>>, vector<8x128xf32>
      tpu.vector_store %arg9[%c0_193, %c0_194], %388 {strides = array<i32>} : memref<8x128xf32, #tpu.memory_space<vmem>>, vector<8x128xf32>,
      %cst_195 = arith.constant 0.000000e+00 : f32
      %390 = vector.broadcast %cst_195 : f32 to vector<8x128xf32>
      %c0_196 = arith.constant 0 : index
      %c0_197 = arith.constant 0 : index
      %391 = vector.load %arg10[%c0_196, %c0_197] : memref<8x128xf32, #tpu.memory_space<vmem>>, vector<8x128xf32>
      tpu.vector_store %arg10[%c0_196, %c0_197], %390 {strides = array<i32>} : memref<8x128xf32, #tpu.memory_space<vmem>>, vector<8x128xf32>,
    } else {
    }
    %c0 = arith.constant 0 : index
    %c0_1 = arith.constant 0 : index
    %c0_2 = arith.constant 0 : index
    %3 = vector.load %arg1[%c0, %c0_1, %c0_2] : memref<8x8x32xbf16, #tpu.memory_space<vmem>>, vector<8x8x32xbf16>
    %4 = vector.shape_cast %3 : vector<8x8x32xbf16> to vector<64x32xbf16>
    %c0_3 = arith.constant 0 : index
    %c0_4 = arith.constant 0 : index
    %5 = vector.load %arg6[%c0_3, %c0_4] : memref<32x512xbf16, #tpu.memory_space<vmem>>, vector<32x512xbf16>
    %cst = arith.constant dense<0.000000e+00> : vector<64x512xf32>
    %6 = tpu.matmul %4, %5, %cst {dimension_numbers = #tpu.dot_dimension_numbers<[1], [0], [0], [1], [0, 0, 1, 1], [], []>} : vector<64x32xbf16>, vector<32x512xbf16>, vector<64x512xf32> -> vector<64x512xf32>
    %c0_5 = arith.constant 0 : index
    %c0_6 = arith.constant 0 : index
    %7 = vector.load %arg2[%c0_5, %c0_6] : memref<1x512xf32, #tpu.memory_space<vmem>>, vector<1x512xf32>
    %8 = vector.broadcast %7 : vector<1x512xf32> to vector<64x512xf32>
    %9 = arith.addf %6, %8 : vector<64x512xf32>
    %c0_7 = arith.constant 0 : index
    %c0_8 = arith.constant 0 : index
    %10 = vector.load %arg8[%c0_7, %c0_8] : memref<64x512xf32, #tpu.memory_space<vmem>>, vector<64x512xf32>
    tpu.vector_store %arg8[%c0_7, %c0_8], %9 {strides = array<i32>} : memref<64x512xf32, #tpu.memory_space<vmem>>, vector<64x512xf32>,
    %c0_9 = arith.constant 0 : index
    %c0_10 = arith.constant 0 : index
    %11 = vector.load %arg7[%c0_9, %c0_10] : memref<128x512xbf16, #tpu.memory_space<vmem>>, vector<128x512xbf16>
    %c0_i32_11 = arith.constant 0 : i32
    %c0_12 = arith.constant 0 : index
    %c0_13 = arith.constant 0 : index
    %12 = vector.load %arg9[%c0_12, %c0_13] : memref<8x128xf32, #tpu.memory_space<vmem>>, vector<8x128xf32>
    %c0_14 = arith.constant 0 : index
    %c0_15 = arith.constant 0 : index
    %13 = vector.load %arg10[%c0_14, %c0_15] : memref<8x128xf32, #tpu.memory_space<vmem>>, vector<8x128xf32>
    %c8_i32 = arith.constant 8 : i32
    %14 = arith.muli %c0_i32_11, %c8_i32 : i32
    %15 = tpu.assume_multiple %14, 8 : i32
    %16 = arith.index_cast %15 : i32 to index
    %c0_16 = arith.constant 0 : index
    %17 = vector.load %arg8[%16, %c0_16] : memref<64x512xf32, #tpu.memory_space<vmem>>, vector<8x512xf32>
    %18 = arith.truncf %12 : vector<8x128xf32> to vector<8x128xbf16>
    %cst_17 = arith.constant dense<0.000000e+00> : vector<8x512xf32>
    %19 = tpu.matmul %18, %11, %cst_17 {dimension_numbers = #tpu.dot_dimension_numbers<[1], [0], [0], [1], [0, 0, 1, 1], [], []>} : vector<8x128xbf16>, vector<128x512xbf16>, vector<8x512xf32> -> vector<8x512xf32>
    %20 = arith.addf %17, %19 : vector<8x512xf32>
    %21 = vector.extract_strided_slice %20 {offsets = [0, 0], sizes = [8, 128], strides = [1, 1]} : vector<8x512xf32> to vector<8x128xf32>
    %cst_18 = arith.constant 5.000000e-01 : f32
    %22 = vector.broadcast %cst_18 : f32 to vector<8x128xf32>
    %23 = arith.mulf %22, %21 : vector<8x128xf32>
    %24 = math.tanh %23 : vector<8x128xf32>
    %cst_19 = arith.constant 1.000000e+00 : f32
    %25 = vector.broadcast %cst_19 : f32 to vector<8x128xf32>
    %26 = arith.addf %24, %25 : vector<8x128xf32>
    %cst_20 = arith.constant 5.000000e-01 : f32
    %27 = vector.broadcast %cst_20 : f32 to vector<8x128xf32>
    %28 = arith.mulf %27, %26 : vector<8x128xf32>
    %29 = vector.extract_strided_slice %20 {offsets = [0, 128], sizes = [8, 128], strides = [1, 1]} : vector<8x512xf32> to vector<8x128xf32>
    %cst_21 = arith.constant 5.000000e-01 : f32
    %30 = vector.broadcast %cst_21 : f32 to vector<8x128xf32>
    %31 = arith.mulf %30, %29 : vector<8x128xf32>
    %32 = math.tanh %31 : vector<8x128xf32>
    %cst_22 = arith.constant 1.000000e+00 : f32
    %33 = vector.broadcast %cst_22 : f32 to vector<8x128xf32>
    %34 = arith.addf %32, %33 : vector<8x128xf32>
    %cst_23 = arith.constant 5.000000e-01 : f32
    %35 = vector.broadcast %cst_23 : f32 to vector<8x128xf32>
    %36 = arith.mulf %35, %34 : vector<8x128xf32>
    %37 = vector.extract_strided_slice %20 {offsets = [0, 256], sizes = [8, 128], strides = [1, 1]} : vector<8x512xf32> to vector<8x128xf32>
    %38 = math.tanh %37 : vector<8x128xf32>
    %39 = vector.extract_strided_slice %20 {offsets = [0, 384], sizes = [8, 128], strides = [1, 1]} : vector<8x512xf32> to vector<8x128xf32>
    %cst_24 = arith.constant 5.000000e-01 : f32
    %40 = vector.broadcast %cst_24 : f32 to vector<8x128xf32>
    %41 = arith.mulf %40, %39 : vector<8x128xf32>
    %42 = math.tanh %41 : vector<8x128xf32>
    %cst_25 = arith.constant 1.000000e+00 : f32
    %43 = vector.broadcast %cst_25 : f32 to vector<8x128xf32>
    %44 = arith.addf %42, %43 : vector<8x128xf32>
    %cst_26 = arith.constant 5.000000e-01 : f32
    %45 = vector.broadcast %cst_26 : f32 to vector<8x128xf32>
    %46 = arith.mulf %45, %44 : vector<8x128xf32>
    %47 = arith.mulf %36, %13 : vector<8x128xf32>
    %48 = arith.mulf %28, %38 : vector<8x128xf32>
    %49 = arith.addf %47, %48 : vector<8x128xf32>
    %50 = math.tanh %49 : vector<8x128xf32>
    %51 = arith.mulf %46, %50 : vector<8x128xf32>
    %c0_27 = arith.constant 0 : index
    %c0_28 = arith.constant 0 : index
    %52 = vector.load %arg9[%c0_27, %c0_28] : memref<8x128xf32, #tpu.memory_space<vmem>>, vector<8x128xf32>
    tpu.vector_store %arg9[%c0_27, %c0_28], %51 {strides = array<i32>} : memref<8x128xf32, #tpu.memory_space<vmem>>, vector<8x128xf32>,
    %c0_29 = arith.constant 0 : index
    %c0_30 = arith.constant 0 : index
    %53 = vector.load %arg10[%c0_29, %c0_30] : memref<8x128xf32, #tpu.memory_space<vmem>>, vector<8x128xf32>
    tpu.vector_store %arg10[%c0_29, %c0_30], %49 {strides = array<i32>} : memref<8x128xf32, #tpu.memory_space<vmem>>, vector<8x128xf32>,
    %54 = arith.index_cast %c0_i32_11 : i32 to index
    %c0_31 = arith.constant 0 : index
    %c0_32 = arith.constant 0 : index
    %55 = vector.load %arg5[%54, %c0_31, %c0_32] : memref<8x8x128xf32, #tpu.memory_space<vmem>>, vector<1x8x128xf32>
    %56 = vector.shape_cast %55 : vector<1x8x128xf32> to vector<8x128xf32>
    %57 = vector.shape_cast %51 : vector<8x128xf32> to vector<1x8x128xf32>
    tpu.vector_store %arg5[%54, %c0_31, %c0_32], %57 {strides = array<i32>} : memref<8x8x128xf32, #tpu.memory_space<vmem>>, vector<1x8x128xf32>,
    %c1_i32 = arith.constant 1 : i32
    %c0_33 = arith.constant 0 : index
    %c0_34 = arith.constant 0 : index
    %58 = vector.load %arg9[%c0_33, %c0_34] : memref<8x128xf32, #tpu.memory_space<vmem>>, vector<8x128xf32>
    %c0_35 = arith.constant 0 : index
    %c0_36 = arith.constant 0 : index
    %59 = vector.load %arg10[%c0_35, %c0_36] : memref<8x128xf32, #tpu.memory_space<vmem>>, vector<8x128xf32>
    %c8_i32_37 = arith.constant 8 : i32
    %60 = arith.muli %c1_i32, %c8_i32_37 : i32
    %61 = tpu.assume_multiple %60, 8 : i32
    %62 = arith.index_cast %61 : i32 to index
    %c0_38 = arith.constant 0 : index
    %63 = vector.load %arg8[%62, %c0_38] : memref<64x512xf32, #tpu.memory_space<vmem>>, vector<8x512xf32>
    %64 = arith.truncf %58 : vector<8x128xf32> to vector<8x128xbf16>
    %cst_39 = arith.constant dense<0.000000e+00> : vector<8x512xf32>
    %65 = tpu.matmul %64, %11, %cst_39 {dimension_numbers = #tpu.dot_dimension_numbers<[1], [0], [0], [1], [0, 0, 1, 1], [], []>} : vector<8x128xbf16>, vector<128x512xbf16>, vector<8x512xf32> -> vector<8x512xf32>
    %66 = arith.addf %63, %65 : vector<8x512xf32>
    %67 = vector.extract_strided_slice %66 {offsets = [0, 0], sizes = [8, 128], strides = [1, 1]} : vector<8x512xf32> to vector<8x128xf32>
    %cst_40 = arith.constant 5.000000e-01 : f32
    %68 = vector.broadcast %cst_40 : f32 to vector<8x128xf32>
    %69 = arith.mulf %68, %67 : vector<8x128xf32>
    %70 = math.tanh %69 : vector<8x128xf32>
    %cst_41 = arith.constant 1.000000e+00 : f32
    %71 = vector.broadcast %cst_41 : f32 to vector<8x128xf32>
    %72 = arith.addf %70, %71 : vector<8x128xf32>
    %cst_42 = arith.constant 5.000000e-01 : f32
    %73 = vector.broadcast %cst_42 : f32 to vector<8x128xf32>
    %74 = arith.mulf %73, %72 : vector<8x128xf32>
    %75 = vector.extract_strided_slice %66 {offsets = [0, 128], sizes = [8, 128], strides = [1, 1]} : vector<8x512xf32> to vector<8x128xf32>
    %cst_43 = arith.constant 5.000000e-01 : f32
    %76 = vector.broadcast %cst_43 : f32 to vector<8x128xf32>
    %77 = arith.mulf %76, %75 : vector<8x128xf32>
    %78 = math.tanh %77 : vector<8x128xf32>
    %cst_44 = arith.constant 1.000000e+00 : f32
    %79 = vector.broadcast %cst_44 : f32 to vector<8x128xf32>
    %80 = arith.addf %78, %79 : vector<8x128xf32>
    %cst_45 = arith.constant 5.000000e-01 : f32
    %81 = vector.broadcast %cst_45 : f32 to vector<8x128xf32>
    %82 = arith.mulf %81, %80 : vector<8x128xf32>
    %83 = vector.extract_strided_slice %66 {offsets = [0, 256], sizes = [8, 128], strides = [1, 1]} : vector<8x512xf32> to vector<8x128xf32>
    %84 = math.tanh %83 : vector<8x128xf32>
    %85 = vector.extract_strided_slice %66 {offsets = [0, 384], sizes = [8, 128], strides = [1, 1]} : vector<8x512xf32> to vector<8x128xf32>
    %cst_46 = arith.constant 5.000000e-01 : f32
    %86 = vector.broadcast %cst_46 : f32 to vector<8x128xf32>
    %87 = arith.mulf %86, %85 : vector<8x128xf32>
    %88 = math.tanh %87 : vector<8x128xf32>
    %cst_47 = arith.constant 1.000000e+00 : f32
    %89 = vector.broadcast %cst_47 : f32 to vector<8x128xf32>
    %90 = arith.addf %88, %89 : vector<8x128xf32>
    %cst_48 = arith.constant 5.000000e-01 : f32
    %91 = vector.broadcast %cst_48 : f32 to vector<8x128xf32>
    %92 = arith.mulf %91, %90 : vector<8x128xf32>
    %93 = arith.mulf %82, %59 : vector<8x128xf32>
    %94 = arith.mulf %74, %84 : vector<8x128xf32>
    %95 = arith.addf %93, %94 : vector<8x128xf32>
    %96 = math.tanh %95 : vector<8x128xf32>
    %97 = arith.mulf %92, %96 : vector<8x128xf32>
    %c0_49 = arith.constant 0 : index
    %c0_50 = arith.constant 0 : index
    %98 = vector.load %arg9[%c0_49, %c0_50] : memref<8x128xf32, #tpu.memory_space<vmem>>, vector<8x128xf32>
    tpu.vector_store %arg9[%c0_49, %c0_50], %97 {strides = array<i32>} : memref<8x128xf32, #tpu.memory_space<vmem>>, vector<8x128xf32>,
    %c0_51 = arith.constant 0 : index
    %c0_52 = arith.constant 0 : index
    %99 = vector.load %arg10[%c0_51, %c0_52] : memref<8x128xf32, #tpu.memory_space<vmem>>, vector<8x128xf32>
    tpu.vector_store %arg10[%c0_51, %c0_52], %95 {strides = array<i32>} : memref<8x128xf32, #tpu.memory_space<vmem>>, vector<8x128xf32>,
    %100 = arith.index_cast %c1_i32 : i32 to index
    %c0_53 = arith.constant 0 : index
    %c0_54 = arith.constant 0 : index
    %101 = vector.load %arg5[%100, %c0_53, %c0_54] : memref<8x8x128xf32, #tpu.memory_space<vmem>>, vector<1x8x128xf32>
    %102 = vector.shape_cast %101 : vector<1x8x128xf32> to vector<8x128xf32>
    %103 = vector.shape_cast %97 : vector<8x128xf32> to vector<1x8x128xf32>
    tpu.vector_store %arg5[%100, %c0_53, %c0_54], %103 {strides = array<i32>} : memref<8x8x128xf32, #tpu.memory_space<vmem>>, vector<1x8x128xf32>,
    %c2_i32 = arith.constant 2 : i32
    %c0_55 = arith.constant 0 : index
    %c0_56 = arith.constant 0 : index
    %104 = vector.load %arg9[%c0_55, %c0_56] : memref<8x128xf32, #tpu.memory_space<vmem>>, vector<8x128xf32>
    %c0_57 = arith.constant 0 : index
    %c0_58 = arith.constant 0 : index
    %105 = vector.load %arg10[%c0_57, %c0_58] : memref<8x128xf32, #tpu.memory_space<vmem>>, vector<8x128xf32>
    %c8_i32_59 = arith.constant 8 : i32
    %106 = arith.muli %c2_i32, %c8_i32_59 : i32
    %107 = tpu.assume_multiple %106, 8 : i32
    %108 = arith.index_cast %107 : i32 to index
    %c0_60 = arith.constant 0 : index
    %109 = vector.load %arg8[%108, %c0_60] : memref<64x512xf32, #tpu.memory_space<vmem>>, vector<8x512xf32>
    %110 = arith.truncf %104 : vector<8x128xf32> to vector<8x128xbf16>
    %cst_61 = arith.constant dense<0.000000e+00> : vector<8x512xf32>
    %111 = tpu.matmul %110, %11, %cst_61 {dimension_numbers = #tpu.dot_dimension_numbers<[1], [0], [0], [1], [0, 0, 1, 1], [], []>} : vector<8x128xbf16>, vector<128x512xbf16>, vector<8x512xf32> -> vector<8x512xf32>
    %112 = arith.addf %109, %111 : vector<8x512xf32>
    %113 = vector.extract_strided_slice %112 {offsets = [0, 0], sizes = [8, 128], strides = [1, 1]} : vector<8x512xf32> to vector<8x128xf32>
    %cst_62 = arith.constant 5.000000e-01 : f32
    %114 = vector.broadcast %cst_62 : f32 to vector<8x128xf32>
    %115 = arith.mulf %114, %113 : vector<8x128xf32>
    %116 = math.tanh %115 : vector<8x128xf32>
    %cst_63 = arith.constant 1.000000e+00 : f32
    %117 = vector.broadcast %cst_63 : f32 to vector<8x128xf32>
    %118 = arith.addf %116, %117 : vector<8x128xf32>
    %cst_64 = arith.constant 5.000000e-01 : f32
    %119 = vector.broadcast %cst_64 : f32 to vector<8x128xf32>
    %120 = arith.mulf %119, %118 : vector<8x128xf32>
    %121 = vector.extract_strided_slice %112 {offsets = [0, 128], sizes = [8, 128], strides = [1, 1]} : vector<8x512xf32> to vector<8x128xf32>
    %cst_65 = arith.constant 5.000000e-01 : f32
    %122 = vector.broadcast %cst_65 : f32 to vector<8x128xf32>
    %123 = arith.mulf %122, %121 : vector<8x128xf32>
    %124 = math.tanh %123 : vector<8x128xf32>
    %cst_66 = arith.constant 1.000000e+00 : f32
    %125 = vector.broadcast %cst_66 : f32 to vector<8x128xf32>
    %126 = arith.addf %124, %125 : vector<8x128xf32>
    %cst_67 = arith.constant 5.000000e-01 : f32
    %127 = vector.broadcast %cst_67 : f32 to vector<8x128xf32>
    %128 = arith.mulf %127, %126 : vector<8x128xf32>
    %129 = vector.extract_strided_slice %112 {offsets = [0, 256], sizes = [8, 128], strides = [1, 1]} : vector<8x512xf32> to vector<8x128xf32>
    %130 = math.tanh %129 : vector<8x128xf32>
    %131 = vector.extract_strided_slice %112 {offsets = [0, 384], sizes = [8, 128], strides = [1, 1]} : vector<8x512xf32> to vector<8x128xf32>
    %cst_68 = arith.constant 5.000000e-01 : f32
    %132 = vector.broadcast %cst_68 : f32 to vector<8x128xf32>
    %133 = arith.mulf %132, %131 : vector<8x128xf32>
    %134 = math.tanh %133 : vector<8x128xf32>
    %cst_69 = arith.constant 1.000000e+00 : f32
    %135 = vector.broadcast %cst_69 : f32 to vector<8x128xf32>
    %136 = arith.addf %134, %135 : vector<8x128xf32>
    %cst_70 = arith.constant 5.000000e-01 : f32
    %137 = vector.broadcast %cst_70 : f32 to vector<8x128xf32>
    %138 = arith.mulf %137, %136 : vector<8x128xf32>
    %139 = arith.mulf %128, %105 : vector<8x128xf32>
    %140 = arith.mulf %120, %130 : vector<8x128xf32>
    %141 = arith.addf %139, %140 : vector<8x128xf32>
    %142 = math.tanh %141 : vector<8x128xf32>
    %143 = arith.mulf %138, %142 : vector<8x128xf32>
    %c0_71 = arith.constant 0 : index
    %c0_72 = arith.constant 0 : index
    %144 = vector.load %arg9[%c0_71, %c0_72] : memref<8x128xf32, #tpu.memory_space<vmem>>, vector<8x128xf32>
    tpu.vector_store %arg9[%c0_71, %c0_72], %143 {strides = array<i32>} : memref<8x128xf32, #tpu.memory_space<vmem>>, vector<8x128xf32>,
    %c0_73 = arith.constant 0 : index
    %c0_74 = arith.constant 0 : index
    %145 = vector.load %arg10[%c0_73, %c0_74] : memref<8x128xf32, #tpu.memory_space<vmem>>, vector<8x128xf32>
    tpu.vector_store %arg10[%c0_73, %c0_74], %141 {strides = array<i32>} : memref<8x128xf32, #tpu.memory_space<vmem>>, vector<8x128xf32>,
    %146 = arith.index_cast %c2_i32 : i32 to index
    %c0_75 = arith.constant 0 : index
    %c0_76 = arith.constant 0 : index
    %147 = vector.load %arg5[%146, %c0_75, %c0_76] : memref<8x8x128xf32, #tpu.memory_space<vmem>>, vector<1x8x128xf32>
    %148 = vector.shape_cast %147 : vector<1x8x128xf32> to vector<8x128xf32>
    %149 = vector.shape_cast %143 : vector<8x128xf32> to vector<1x8x128xf32>
    tpu.vector_store %arg5[%146, %c0_75, %c0_76], %149 {strides = array<i32>} : memref<8x8x128xf32, #tpu.memory_space<vmem>>, vector<1x8x128xf32>,
    %c3_i32 = arith.constant 3 : i32
    %c0_77 = arith.constant 0 : index
    %c0_78 = arith.constant 0 : index
    %150 = vector.load %arg9[%c0_77, %c0_78] : memref<8x128xf32, #tpu.memory_space<vmem>>, vector<8x128xf32>
    %c0_79 = arith.constant 0 : index
    %c0_80 = arith.constant 0 : index
    %151 = vector.load %arg10[%c0_79, %c0_80] : memref<8x128xf32, #tpu.memory_space<vmem>>, vector<8x128xf32>
    %c8_i32_81 = arith.constant 8 : i32
    %152 = arith.muli %c3_i32, %c8_i32_81 : i32
    %153 = tpu.assume_multiple %152, 8 : i32
    %154 = arith.index_cast %153 : i32 to index
    %c0_82 = arith.constant 0 : index
    %155 = vector.load %arg8[%154, %c0_82] : memref<64x512xf32, #tpu.memory_space<vmem>>, vector<8x512xf32>
    %156 = arith.truncf %150 : vector<8x128xf32> to vector<8x128xbf16>
    %cst_83 = arith.constant dense<0.000000e+00> : vector<8x512xf32>
    %157 = tpu.matmul %156, %11, %cst_83 {dimension_numbers = #tpu.dot_dimension_numbers<[1], [0], [0], [1], [0, 0, 1, 1], [], []>} : vector<8x128xbf16>, vector<128x512xbf16>, vector<8x512xf32> -> vector<8x512xf32>
    %158 = arith.addf %155, %157 : vector<8x512xf32>
    %159 = vector.extract_strided_slice %158 {offsets = [0, 0], sizes = [8, 128], strides = [1, 1]} : vector<8x512xf32> to vector<8x128xf32>
    %cst_84 = arith.constant 5.000000e-01 : f32
    %160 = vector.broadcast %cst_84 : f32 to vector<8x128xf32>
    %161 = arith.mulf %160, %159 : vector<8x128xf32>
    %162 = math.tanh %161 : vector<8x128xf32>
    %cst_85 = arith.constant 1.000000e+00 : f32
    %163 = vector.broadcast %cst_85 : f32 to vector<8x128xf32>
    %164 = arith.addf %162, %163 : vector<8x128xf32>
    %cst_86 = arith.constant 5.000000e-01 : f32
    %165 = vector.broadcast %cst_86 : f32 to vector<8x128xf32>
    %166 = arith.mulf %165, %164 : vector<8x128xf32>
    %167 = vector.extract_strided_slice %158 {offsets = [0, 128], sizes = [8, 128], strides = [1, 1]} : vector<8x512xf32> to vector<8x128xf32>
    %cst_87 = arith.constant 5.000000e-01 : f32
    %168 = vector.broadcast %cst_87 : f32 to vector<8x128xf32>
    %169 = arith.mulf %168, %167 : vector<8x128xf32>
    %170 = math.tanh %169 : vector<8x128xf32>
    %cst_88 = arith.constant 1.000000e+00 : f32
    %171 = vector.broadcast %cst_88 : f32 to vector<8x128xf32>
    %172 = arith.addf %170, %171 : vector<8x128xf32>
    %cst_89 = arith.constant 5.000000e-01 : f32
    %173 = vector.broadcast %cst_89 : f32 to vector<8x128xf32>
    %174 = arith.mulf %173, %172 : vector<8x128xf32>
    %175 = vector.extract_strided_slice %158 {offsets = [0, 256], sizes = [8, 128], strides = [1, 1]} : vector<8x512xf32> to vector<8x128xf32>
    %176 = math.tanh %175 : vector<8x128xf32>
    %177 = vector.extract_strided_slice %158 {offsets = [0, 384], sizes = [8, 128], strides = [1, 1]} : vector<8x512xf32> to vector<8x128xf32>
    %cst_90 = arith.constant 5.000000e-01 : f32
    %178 = vector.broadcast %cst_90 : f32 to vector<8x128xf32>
    %179 = arith.mulf %178, %177 : vector<8x128xf32>
    %180 = math.tanh %179 : vector<8x128xf32>
    %cst_91 = arith.constant 1.000000e+00 : f32
    %181 = vector.broadcast %cst_91 : f32 to vector<8x128xf32>
    %182 = arith.addf %180, %181 : vector<8x128xf32>
    %cst_92 = arith.constant 5.000000e-01 : f32
    %183 = vector.broadcast %cst_92 : f32 to vector<8x128xf32>
    %184 = arith.mulf %183, %182 : vector<8x128xf32>
    %185 = arith.mulf %174, %151 : vector<8x128xf32>
    %186 = arith.mulf %166, %176 : vector<8x128xf32>
    %187 = arith.addf %185, %186 : vector<8x128xf32>
    %188 = math.tanh %187 : vector<8x128xf32>
    %189 = arith.mulf %184, %188 : vector<8x128xf32>
    %c0_93 = arith.constant 0 : index
    %c0_94 = arith.constant 0 : index
    %190 = vector.load %arg9[%c0_93, %c0_94] : memref<8x128xf32, #tpu.memory_space<vmem>>, vector<8x128xf32>
    tpu.vector_store %arg9[%c0_93, %c0_94], %189 {strides = array<i32>} : memref<8x128xf32, #tpu.memory_space<vmem>>, vector<8x128xf32>,
    %c0_95 = arith.constant 0 : index
    %c0_96 = arith.constant 0 : index
    %191 = vector.load %arg10[%c0_95, %c0_96] : memref<8x128xf32, #tpu.memory_space<vmem>>, vector<8x128xf32>
    tpu.vector_store %arg10[%c0_95, %c0_96], %187 {strides = array<i32>} : memref<8x128xf32, #tpu.memory_space<vmem>>, vector<8x128xf32>,
    %192 = arith.index_cast %c3_i32 : i32 to index
    %c0_97 = arith.constant 0 : index
    %c0_98 = arith.constant 0 : index
    %193 = vector.load %arg5[%192, %c0_97, %c0_98] : memref<8x8x128xf32, #tpu.memory_space<vmem>>, vector<1x8x128xf32>
    %194 = vector.shape_cast %193 : vector<1x8x128xf32> to vector<8x128xf32>
    %195 = vector.shape_cast %189 : vector<8x128xf32> to vector<1x8x128xf32>
    tpu.vector_store %arg5[%192, %c0_97, %c0_98], %195 {strides = array<i32>} : memref<8x8x128xf32, #tpu.memory_space<vmem>>, vector<1x8x128xf32>,
    %c4_i32 = arith.constant 4 : i32
    %c0_99 = arith.constant 0 : index
    %c0_100 = arith.constant 0 : index
    %196 = vector.load %arg9[%c0_99, %c0_100] : memref<8x128xf32, #tpu.memory_space<vmem>>, vector<8x128xf32>
    %c0_101 = arith.constant 0 : index
    %c0_102 = arith.constant 0 : index
    %197 = vector.load %arg10[%c0_101, %c0_102] : memref<8x128xf32, #tpu.memory_space<vmem>>, vector<8x128xf32>
    %c8_i32_103 = arith.constant 8 : i32
    %198 = arith.muli %c4_i32, %c8_i32_103 : i32
    %199 = tpu.assume_multiple %198, 8 : i32
    %200 = arith.index_cast %199 : i32 to index
    %c0_104 = arith.constant 0 : index
    %201 = vector.load %arg8[%200, %c0_104] : memref<64x512xf32, #tpu.memory_space<vmem>>, vector<8x512xf32>
    %202 = arith.truncf %196 : vector<8x128xf32> to vector<8x128xbf16>
    %cst_105 = arith.constant dense<0.000000e+00> : vector<8x512xf32>
    %203 = tpu.matmul %202, %11, %cst_105 {dimension_numbers = #tpu.dot_dimension_numbers<[1], [0], [0], [1], [0, 0, 1, 1], [], []>} : vector<8x128xbf16>, vector<128x512xbf16>, vector<8x512xf32> -> vector<8x512xf32>
    %204 = arith.addf %201, %203 : vector<8x512xf32>
    %205 = vector.extract_strided_slice %204 {offsets = [0, 0], sizes = [8, 128], strides = [1, 1]} : vector<8x512xf32> to vector<8x128xf32>
    %cst_106 = arith.constant 5.000000e-01 : f32
    %206 = vector.broadcast %cst_106 : f32 to vector<8x128xf32>
    %207 = arith.mulf %206, %205 : vector<8x128xf32>
    %208 = math.tanh %207 : vector<8x128xf32>
    %cst_107 = arith.constant 1.000000e+00 : f32
    %209 = vector.broadcast %cst_107 : f32 to vector<8x128xf32>
    %210 = arith.addf %208, %209 : vector<8x128xf32>
    %cst_108 = arith.constant 5.000000e-01 : f32
    %211 = vector.broadcast %cst_108 : f32 to vector<8x128xf32>
    %212 = arith.mulf %211, %210 : vector<8x128xf32>
    %213 = vector.extract_strided_slice %204 {offsets = [0, 128], sizes = [8, 128], strides = [1, 1]} : vector<8x512xf32> to vector<8x128xf32>
    %cst_109 = arith.constant 5.000000e-01 : f32
    %214 = vector.broadcast %cst_109 : f32 to vector<8x128xf32>
    %215 = arith.mulf %214, %213 : vector<8x128xf32>
    %216 = math.tanh %215 : vector<8x128xf32>
    %cst_110 = arith.constant 1.000000e+00 : f32
    %217 = vector.broadcast %cst_110 : f32 to vector<8x128xf32>
    %218 = arith.addf %216, %217 : vector<8x128xf32>
    %cst_111 = arith.constant 5.000000e-01 : f32
    %219 = vector.broadcast %cst_111 : f32 to vector<8x128xf32>
    %220 = arith.mulf %219, %218 : vector<8x128xf32>
    %221 = vector.extract_strided_slice %204 {offsets = [0, 256], sizes = [8, 128], strides = [1, 1]} : vector<8x512xf32> to vector<8x128xf32>
    %222 = math.tanh %221 : vector<8x128xf32>
    %223 = vector.extract_strided_slice %204 {offsets = [0, 384], sizes = [8, 128], strides = [1, 1]} : vector<8x512xf32> to vector<8x128xf32>
    %cst_112 = arith.constant 5.000000e-01 : f32
    %224 = vector.broadcast %cst_112 : f32 to vector<8x128xf32>
    %225 = arith.mulf %224, %223 : vector<8x128xf32>
    %226 = math.tanh %225 : vector<8x128xf32>
    %cst_113 = arith.constant 1.000000e+00 : f32
    %227 = vector.broadcast %cst_113 : f32 to vector<8x128xf32>
    %228 = arith.addf %226, %227 : vector<8x128xf32>
    %cst_114 = arith.constant 5.000000e-01 : f32
    %229 = vector.broadcast %cst_114 : f32 to vector<8x128xf32>
    %230 = arith.mulf %229, %228 : vector<8x128xf32>
    %231 = arith.mulf %220, %197 : vector<8x128xf32>
    %232 = arith.mulf %212, %222 : vector<8x128xf32>
    %233 = arith.addf %231, %232 : vector<8x128xf32>
    %234 = math.tanh %233 : vector<8x128xf32>
    %235 = arith.mulf %230, %234 : vector<8x128xf32>
    %c0_115 = arith.constant 0 : index
    %c0_116 = arith.constant 0 : index
    %236 = vector.load %arg9[%c0_115, %c0_116] : memref<8x128xf32, #tpu.memory_space<vmem>>, vector<8x128xf32>
    tpu.vector_store %arg9[%c0_115, %c0_116], %235 {strides = array<i32>} : memref<8x128xf32, #tpu.memory_space<vmem>>, vector<8x128xf32>,
    %c0_117 = arith.constant 0 : index
    %c0_118 = arith.constant 0 : index
    %237 = vector.load %arg10[%c0_117, %c0_118] : memref<8x128xf32, #tpu.memory_space<vmem>>, vector<8x128xf32>
    tpu.vector_store %arg10[%c0_117, %c0_118], %233 {strides = array<i32>} : memref<8x128xf32, #tpu.memory_space<vmem>>, vector<8x128xf32>,
    %238 = arith.index_cast %c4_i32 : i32 to index
    %c0_119 = arith.constant 0 : index
    %c0_120 = arith.constant 0 : index
    %239 = vector.load %arg5[%238, %c0_119, %c0_120] : memref<8x8x128xf32, #tpu.memory_space<vmem>>, vector<1x8x128xf32>
    %240 = vector.shape_cast %239 : vector<1x8x128xf32> to vector<8x128xf32>
    %241 = vector.shape_cast %235 : vector<8x128xf32> to vector<1x8x128xf32>
    tpu.vector_store %arg5[%238, %c0_119, %c0_120], %241 {strides = array<i32>} : memref<8x8x128xf32, #tpu.memory_space<vmem>>, vector<1x8x128xf32>,
    %c5_i32 = arith.constant 5 : i32
    %c0_121 = arith.constant 0 : index
    %c0_122 = arith.constant 0 : index
    %242 = vector.load %arg9[%c0_121, %c0_122] : memref<8x128xf32, #tpu.memory_space<vmem>>, vector<8x128xf32>
    %c0_123 = arith.constant 0 : index
    %c0_124 = arith.constant 0 : index
    %243 = vector.load %arg10[%c0_123, %c0_124] : memref<8x128xf32, #tpu.memory_space<vmem>>, vector<8x128xf32>
    %c8_i32_125 = arith.constant 8 : i32
    %244 = arith.muli %c5_i32, %c8_i32_125 : i32
    %245 = tpu.assume_multiple %244, 8 : i32
    %246 = arith.index_cast %245 : i32 to index
    %c0_126 = arith.constant 0 : index
    %247 = vector.load %arg8[%246, %c0_126] : memref<64x512xf32, #tpu.memory_space<vmem>>, vector<8x512xf32>
    %248 = arith.truncf %242 : vector<8x128xf32> to vector<8x128xbf16>
    %cst_127 = arith.constant dense<0.000000e+00> : vector<8x512xf32>
    %249 = tpu.matmul %248, %11, %cst_127 {dimension_numbers = #tpu.dot_dimension_numbers<[1], [0], [0], [1], [0, 0, 1, 1], [], []>} : vector<8x128xbf16>, vector<128x512xbf16>, vector<8x512xf32> -> vector<8x512xf32>
    %250 = arith.addf %247, %249 : vector<8x512xf32>
    %251 = vector.extract_strided_slice %250 {offsets = [0, 0], sizes = [8, 128], strides = [1, 1]} : vector<8x512xf32> to vector<8x128xf32>
    %cst_128 = arith.constant 5.000000e-01 : f32
    %252 = vector.broadcast %cst_128 : f32 to vector<8x128xf32>
    %253 = arith.mulf %252, %251 : vector<8x128xf32>
    %254 = math.tanh %253 : vector<8x128xf32>
    %cst_129 = arith.constant 1.000000e+00 : f32
    %255 = vector.broadcast %cst_129 : f32 to vector<8x128xf32>
    %256 = arith.addf %254, %255 : vector<8x128xf32>
    %cst_130 = arith.constant 5.000000e-01 : f32
    %257 = vector.broadcast %cst_130 : f32 to vector<8x128xf32>
    %258 = arith.mulf %257, %256 : vector<8x128xf32>
    %259 = vector.extract_strided_slice %250 {offsets = [0, 128], sizes = [8, 128], strides = [1, 1]} : vector<8x512xf32> to vector<8x128xf32>
    %cst_131 = arith.constant 5.000000e-01 : f32
    %260 = vector.broadcast %cst_131 : f32 to vector<8x128xf32>
    %261 = arith.mulf %260, %259 : vector<8x128xf32>
    %262 = math.tanh %261 : vector<8x128xf32>
    %cst_132 = arith.constant 1.000000e+00 : f32
    %263 = vector.broadcast %cst_132 : f32 to vector<8x128xf32>
    %264 = arith.addf %262, %263 : vector<8x128xf32>
    %cst_133 = arith.constant 5.000000e-01 : f32
    %265 = vector.broadcast %cst_133 : f32 to vector<8x128xf32>
    %266 = arith.mulf %265, %264 : vector<8x128xf32>
    %267 = vector.extract_strided_slice %250 {offsets = [0, 256], sizes = [8, 128], strides = [1, 1]} : vector<8x512xf32> to vector<8x128xf32>
    %268 = math.tanh %267 : vector<8x128xf32>
    %269 = vector.extract_strided_slice %250 {offsets = [0, 384], sizes = [8, 128], strides = [1, 1]} : vector<8x512xf32> to vector<8x128xf32>
    %cst_134 = arith.constant 5.000000e-01 : f32
    %270 = vector.broadcast %cst_134 : f32 to vector<8x128xf32>
    %271 = arith.mulf %270, %269 : vector<8x128xf32>
    %272 = math.tanh %271 : vector<8x128xf32>
    %cst_135 = arith.constant 1.000000e+00 : f32
    %273 = vector.broadcast %cst_135 : f32 to vector<8x128xf32>
    %274 = arith.addf %272, %273 : vector<8x128xf32>
    %cst_136 = arith.constant 5.000000e-01 : f32
    %275 = vector.broadcast %cst_136 : f32 to vector<8x128xf32>
    %276 = arith.mulf %275, %274 : vector<8x128xf32>
    %277 = arith.mulf %266, %243 : vector<8x128xf32>
    %278 = arith.mulf %258, %268 : vector<8x128xf32>
    %279 = arith.addf %277, %278 : vector<8x128xf32>
    %280 = math.tanh %279 : vector<8x128xf32>
    %281 = arith.mulf %276, %280 : vector<8x128xf32>
    %c0_137 = arith.constant 0 : index
    %c0_138 = arith.constant 0 : index
    %282 = vector.load %arg9[%c0_137, %c0_138] : memref<8x128xf32, #tpu.memory_space<vmem>>, vector<8x128xf32>
    tpu.vector_store %arg9[%c0_137, %c0_138], %281 {strides = array<i32>} : memref<8x128xf32, #tpu.memory_space<vmem>>, vector<8x128xf32>,
    %c0_139 = arith.constant 0 : index
    %c0_140 = arith.constant 0 : index
    %283 = vector.load %arg10[%c0_139, %c0_140] : memref<8x128xf32, #tpu.memory_space<vmem>>, vector<8x128xf32>
    tpu.vector_store %arg10[%c0_139, %c0_140], %279 {strides = array<i32>} : memref<8x128xf32, #tpu.memory_space<vmem>>, vector<8x128xf32>,
    %284 = arith.index_cast %c5_i32 : i32 to index
    %c0_141 = arith.constant 0 : index
    %c0_142 = arith.constant 0 : index
    %285 = vector.load %arg5[%284, %c0_141, %c0_142] : memref<8x8x128xf32, #tpu.memory_space<vmem>>, vector<1x8x128xf32>
    %286 = vector.shape_cast %285 : vector<1x8x128xf32> to vector<8x128xf32>
    %287 = vector.shape_cast %281 : vector<8x128xf32> to vector<1x8x128xf32>
    tpu.vector_store %arg5[%284, %c0_141, %c0_142], %287 {strides = array<i32>} : memref<8x8x128xf32, #tpu.memory_space<vmem>>, vector<1x8x128xf32>,
    %c6_i32 = arith.constant 6 : i32
    %c0_143 = arith.constant 0 : index
    %c0_144 = arith.constant 0 : index
    %288 = vector.load %arg9[%c0_143, %c0_144] : memref<8x128xf32, #tpu.memory_space<vmem>>, vector<8x128xf32>
    %c0_145 = arith.constant 0 : index
    %c0_146 = arith.constant 0 : index
    %289 = vector.load %arg10[%c0_145, %c0_146] : memref<8x128xf32, #tpu.memory_space<vmem>>, vector<8x128xf32>
    %c8_i32_147 = arith.constant 8 : i32
    %290 = arith.muli %c6_i32, %c8_i32_147 : i32
    %291 = tpu.assume_multiple %290, 8 : i32
    %292 = arith.index_cast %291 : i32 to index
    %c0_148 = arith.constant 0 : index
    %293 = vector.load %arg8[%292, %c0_148] : memref<64x512xf32, #tpu.memory_space<vmem>>, vector<8x512xf32>
    %294 = arith.truncf %288 : vector<8x128xf32> to vector<8x128xbf16>
    %cst_149 = arith.constant dense<0.000000e+00> : vector<8x512xf32>
    %295 = tpu.matmul %294, %11, %cst_149 {dimension_numbers = #tpu.dot_dimension_numbers<[1], [0], [0], [1], [0, 0, 1, 1], [], []>} : vector<8x128xbf16>, vector<128x512xbf16>, vector<8x512xf32> -> vector<8x512xf32>
    %296 = arith.addf %293, %295 : vector<8x512xf32>
    %297 = vector.extract_strided_slice %296 {offsets = [0, 0], sizes = [8, 128], strides = [1, 1]} : vector<8x512xf32> to vector<8x128xf32>
    %cst_150 = arith.constant 5.000000e-01 : f32
    %298 = vector.broadcast %cst_150 : f32 to vector<8x128xf32>
    %299 = arith.mulf %298, %297 : vector<8x128xf32>
    %300 = math.tanh %299 : vector<8x128xf32>
    %cst_151 = arith.constant 1.000000e+00 : f32
    %301 = vector.broadcast %cst_151 : f32 to vector<8x128xf32>
    %302 = arith.addf %300, %301 : vector<8x128xf32>
    %cst_152 = arith.constant 5.000000e-01 : f32
    %303 = vector.broadcast %cst_152 : f32 to vector<8x128xf32>
    %304 = arith.mulf %303, %302 : vector<8x128xf32>
    %305 = vector.extract_strided_slice %296 {offsets = [0, 128], sizes = [8, 128], strides = [1, 1]} : vector<8x512xf32> to vector<8x128xf32>
    %cst_153 = arith.constant 5.000000e-01 : f32
    %306 = vector.broadcast %cst_153 : f32 to vector<8x128xf32>
    %307 = arith.mulf %306, %305 : vector<8x128xf32>
    %308 = math.tanh %307 : vector<8x128xf32>
    %cst_154 = arith.constant 1.000000e+00 : f32
    %309 = vector.broadcast %cst_154 : f32 to vector<8x128xf32>
    %310 = arith.addf %308, %309 : vector<8x128xf32>
    %cst_155 = arith.constant 5.000000e-01 : f32
    %311 = vector.broadcast %cst_155 : f32 to vector<8x128xf32>
    %312 = arith.mulf %311, %310 : vector<8x128xf32>
    %313 = vector.extract_strided_slice %296 {offsets = [0, 256], sizes = [8, 128], strides = [1, 1]} : vector<8x512xf32> to vector<8x128xf32>
    %314 = math.tanh %313 : vector<8x128xf32>
    %315 = vector.extract_strided_slice %296 {offsets = [0, 384], sizes = [8, 128], strides = [1, 1]} : vector<8x512xf32> to vector<8x128xf32>
    %cst_156 = arith.constant 5.000000e-01 : f32
    %316 = vector.broadcast %cst_156 : f32 to vector<8x128xf32>
    %317 = arith.mulf %316, %315 : vector<8x128xf32>
    %318 = math.tanh %317 : vector<8x128xf32>
    %cst_157 = arith.constant 1.000000e+00 : f32
    %319 = vector.broadcast %cst_157 : f32 to vector<8x128xf32>
    %320 = arith.addf %318, %319 : vector<8x128xf32>
    %cst_158 = arith.constant 5.000000e-01 : f32
    %321 = vector.broadcast %cst_158 : f32 to vector<8x128xf32>
    %322 = arith.mulf %321, %320 : vector<8x128xf32>
    %323 = arith.mulf %312, %289 : vector<8x128xf32>
    %324 = arith.mulf %304, %314 : vector<8x128xf32>
    %325 = arith.addf %323, %324 : vector<8x128xf32>
    %326 = math.tanh %325 : vector<8x128xf32>
    %327 = arith.mulf %322, %326 : vector<8x128xf32>
    %c0_159 = arith.constant 0 : index
    %c0_160 = arith.constant 0 : index
    %328 = vector.load %arg9[%c0_159, %c0_160] : memref<8x128xf32, #tpu.memory_space<vmem>>, vector<8x128xf32>
    tpu.vector_store %arg9[%c0_159, %c0_160], %327 {strides = array<i32>} : memref<8x128xf32, #tpu.memory_space<vmem>>, vector<8x128xf32>,
    %c0_161 = arith.constant 0 : index
    %c0_162 = arith.constant 0 : index
    %329 = vector.load %arg10[%c0_161, %c0_162] : memref<8x128xf32, #tpu.memory_space<vmem>>, vector<8x128xf32>
    tpu.vector_store %arg10[%c0_161, %c0_162], %325 {strides = array<i32>} : memref<8x128xf32, #tpu.memory_space<vmem>>, vector<8x128xf32>,
    %330 = arith.index_cast %c6_i32 : i32 to index
    %c0_163 = arith.constant 0 : index
    %c0_164 = arith.constant 0 : index
    %331 = vector.load %arg5[%330, %c0_163, %c0_164] : memref<8x8x128xf32, #tpu.memory_space<vmem>>, vector<1x8x128xf32>
    %332 = vector.shape_cast %331 : vector<1x8x128xf32> to vector<8x128xf32>
    %333 = vector.shape_cast %327 : vector<8x128xf32> to vector<1x8x128xf32>
    tpu.vector_store %arg5[%330, %c0_163, %c0_164], %333 {strides = array<i32>} : memref<8x8x128xf32, #tpu.memory_space<vmem>>, vector<1x8x128xf32>,
    %c7_i32 = arith.constant 7 : i32
    %c0_165 = arith.constant 0 : index
    %c0_166 = arith.constant 0 : index
    %334 = vector.load %arg9[%c0_165, %c0_166] : memref<8x128xf32, #tpu.memory_space<vmem>>, vector<8x128xf32>
    %c0_167 = arith.constant 0 : index
    %c0_168 = arith.constant 0 : index
    %335 = vector.load %arg10[%c0_167, %c0_168] : memref<8x128xf32, #tpu.memory_space<vmem>>, vector<8x128xf32>
    %c8_i32_169 = arith.constant 8 : i32
    %336 = arith.muli %c7_i32, %c8_i32_169 : i32
    %337 = tpu.assume_multiple %336, 8 : i32
    %338 = arith.index_cast %337 : i32 to index
    %c0_170 = arith.constant 0 : index
    %339 = vector.load %arg8[%338, %c0_170] : memref<64x512xf32, #tpu.memory_space<vmem>>, vector<8x512xf32>
    %340 = arith.truncf %334 : vector<8x128xf32> to vector<8x128xbf16>
    %cst_171 = arith.constant dense<0.000000e+00> : vector<8x512xf32>
    %341 = tpu.matmul %340, %11, %cst_171 {dimension_numbers = #tpu.dot_dimension_numbers<[1], [0], [0], [1], [0, 0, 1, 1], [], []>} : vector<8x128xbf16>, vector<128x512xbf16>, vector<8x512xf32> -> vector<8x512xf32>
    %342 = arith.addf %339, %341 : vector<8x512xf32>
    %343 = vector.extract_strided_slice %342 {offsets = [0, 0], sizes = [8, 128], strides = [1, 1]} : vector<8x512xf32> to vector<8x128xf32>
    %cst_172 = arith.constant 5.000000e-01 : f32
    %344 = vector.broadcast %cst_172 : f32 to vector<8x128xf32>
    %345 = arith.mulf %344, %343 : vector<8x128xf32>
    %346 = math.tanh %345 : vector<8x128xf32>
    %cst_173 = arith.constant 1.000000e+00 : f32
    %347 = vector.broadcast %cst_173 : f32 to vector<8x128xf32>
    %348 = arith.addf %346, %347 : vector<8x128xf32>
    %cst_174 = arith.constant 5.000000e-01 : f32
    %349 = vector.broadcast %cst_174 : f32 to vector<8x128xf32>
    %350 = arith.mulf %349, %348 : vector<8x128xf32>
    %351 = vector.extract_strided_slice %342 {offsets = [0, 128], sizes = [8, 128], strides = [1, 1]} : vector<8x512xf32> to vector<8x128xf32>
    %cst_175 = arith.constant 5.000000e-01 : f32
    %352 = vector.broadcast %cst_175 : f32 to vector<8x128xf32>
    %353 = arith.mulf %352, %351 : vector<8x128xf32>
    %354 = math.tanh %353 : vector<8x128xf32>
    %cst_176 = arith.constant 1.000000e+00 : f32
    %355 = vector.broadcast %cst_176 : f32 to vector<8x128xf32>
    %356 = arith.addf %354, %355 : vector<8x128xf32>
    %cst_177 = arith.constant 5.000000e-01 : f32
    %357 = vector.broadcast %cst_177 : f32 to vector<8x128xf32>
    %358 = arith.mulf %357, %356 : vector<8x128xf32>
    %359 = vector.extract_strided_slice %342 {offsets = [0, 256], sizes = [8, 128], strides = [1, 1]} : vector<8x512xf32> to vector<8x128xf32>
    %360 = math.tanh %359 : vector<8x128xf32>
    %361 = vector.extract_strided_slice %342 {offsets = [0, 384], sizes = [8, 128], strides = [1, 1]} : vector<8x512xf32> to vector<8x128xf32>
    %cst_178 = arith.constant 5.000000e-01 : f32
    %362 = vector.broadcast %cst_178 : f32 to vector<8x128xf32>
    %363 = arith.mulf %362, %361 : vector<8x128xf32>
    %364 = math.tanh %363 : vector<8x128xf32>
    %cst_179 = arith.constant 1.000000e+00 : f32
    %365 = vector.broadcast %cst_179 : f32 to vector<8x128xf32>
    %366 = arith.addf %364, %365 : vector<8x128xf32>
    %cst_180 = arith.constant 5.000000e-01 : f32
    %367 = vector.broadcast %cst_180 : f32 to vector<8x128xf32>
    %368 = arith.mulf %367, %366 : vector<8x128xf32>
    %369 = arith.mulf %358, %335 : vector<8x128xf32>
    %370 = arith.mulf %350, %360 : vector<8x128xf32>
    %371 = arith.addf %369, %370 : vector<8x128xf32>
    %372 = math.tanh %371 : vector<8x128xf32>
    %373 = arith.mulf %368, %372 : vector<8x128xf32>
    %c0_181 = arith.constant 0 : index
    %c0_182 = arith.constant 0 : index
    %374 = vector.load %arg9[%c0_181, %c0_182] : memref<8x128xf32, #tpu.memory_space<vmem>>, vector<8x128xf32>
    tpu.vector_store %arg9[%c0_181, %c0_182], %373 {strides = array<i32>} : memref<8x128xf32, #tpu.memory_space<vmem>>, vector<8x128xf32>,
    %c0_183 = arith.constant 0 : index
    %c0_184 = arith.constant 0 : index
    %375 = vector.load %arg10[%c0_183, %c0_184] : memref<8x128xf32, #tpu.memory_space<vmem>>, vector<8x128xf32>
    tpu.vector_store %arg10[%c0_183, %c0_184], %371 {strides = array<i32>} : memref<8x128xf32, #tpu.memory_space<vmem>>, vector<8x128xf32>,
    %376 = arith.index_cast %c7_i32 : i32 to index
    %c0_185 = arith.constant 0 : index
    %c0_186 = arith.constant 0 : index
    %377 = vector.load %arg5[%376, %c0_185, %c0_186] : memref<8x8x128xf32, #tpu.memory_space<vmem>>, vector<1x8x128xf32>
    %378 = vector.shape_cast %377 : vector<1x8x128xf32> to vector<8x128xf32>
    %379 = vector.shape_cast %373 : vector<8x128xf32> to vector<1x8x128xf32>
    tpu.vector_store %arg5[%376, %c0_185, %c0_186], %379 {strides = array<i32>} : memref<8x8x128xf32, #tpu.memory_space<vmem>>, vector<1x8x128xf32>,
    %c8_i32_187 = arith.constant 8 : i32
    return
  }
  func.func @transform_0(%arg0: i32) -> (i32, i32, i32) {
    %c0_i32 = arith.constant 0 : i32
    %c0_i32_0 = arith.constant 0 : i32
    %c0_i32_1 = arith.constant 0 : i32
    return %arg0, %c0_i32, %c0_i32_0 : i32, i32, i32
  }
  func.func @transform_1(%arg0: i32) -> (i32, i32) {
    %c0_i32 = arith.constant 0 : i32
    %c0_i32_0 = arith.constant 0 : i32
    %c0_i32_1 = arith.constant 0 : i32
    return %c0_i32, %c0_i32_0 : i32, i32
  }
  func.func @transform_4(%arg0: i32) -> (i32, i32, i32) {
    %c0_i32 = arith.constant 0 : i32
    %c0_i32_0 = arith.constant 0 : i32
    %c0_i32_1 = arith.constant 0 : i32
    return %arg0, %c0_i32, %c0_i32_0 : i32, i32, i32
  }
}

</mosaic_0001>

<bundles_post_ra>
// kernel: tpu_custom_call.1
= control target key start
LH: loop header
LB: loop body
LE: loop exit
PB: predicated region body
PF: predicated region fallthrough
CT: control target
= control target key end

     0   :  { %s2735_s0 = inlined_call_operand.hbm [shape: bf16[16,8,32], index: 0, kind: input, shape index: {}]   ;;  %s2736_s1 = inlined_call_operand.hbm [shape: f32[1,512], index: 1, kind: input, shape index: {}]   ;;  %s2737_s2 = inlined_call_operand.hbm [shape: bf16[32,512], index: 2, kind: input, shape index: {}]   ;;  %s2738_s3 = inlined_call_operand.hbm [shape: bf16[128,512], index: 3, kind: input, shape index: {}]   ;;  %s2739_s4 = inlined_call_operand.hbm [shape: f32[16,8,128], index: 4, kind: output, shape index: {}]  }
   0x1   :  { %2748 = sst [smem:[#allocation46_spill]] %s2735_s0 }
   0x2   :  { %2749 = sst [smem:[#allocation47_spill]] %s2736_s1 }
   0x3   :  { %9 = vsyncpa [#allocation9], 0 }
   0x4   :  { %11 = vsyncpa [#allocation9 + $0x1], 0 }
   0x5   :  { %12 = vsyncpa [#allocation12], 0 }
   0x6   :  { %13 = vsyncpa [#allocation10], 0 }
   0x7   :  { %15 = vsyncpa [#allocation10 + $0x1], 0  ;;  %s2020_s15 = smov 0   ;;  %s2022_s16 = smov 0  }
   0x8   :  { %s2024_s17 = smov 0   ;;  %s2026_s18 = smov 0  }
   0x9 LB: > { %2750 = sst [smem:[#allocation23_spill]] %s1968_s17  ;;  %s2041_s19 = sadd.s32 4294967295, %s1972_s18   ;;  %s1972_s18 = sphi %s2026_s18, %s2818_s18   ;;  %s1968_s17 = sphi %s2024_s17, %s2815_s17   ;;  %s1964_s16 = sphi %s2022_s16, %s2817_s16   ;;  %s1960_s15 = sphi %s2020_s15, %s2816_s15  }
   0xa   : > { %s1605_s20 = sadd.s32 4294967294, %s1972_s18   ;;  %s2045_s21 = sadd.s32 1, %s1972_s18  }
   0xb   : > { %s28_s22 = sadd.s32 1, %s1968_s17  ;;  %s25_s23 = ssub.s32 %s1972_s18, %s2045_s21 }
   0xc   : > { %p35_p0 = scmp.ne.s32.totalorder %s1968_s17, %s1964_s16  ;;  %p26_p1 = scmp.eq.s32.totalorder %s25_s23, 0 }
   0xd   : > { %p36_p2 = scmp.eq.s32.totalorder %s1972_s18, 0  ;;  %p41_p3 = scmp.ne.s32.totalorder %s1964_s16, %s1960_s15 }
   0xe   : > { %p2740_p4 = scmp.eq.s32.totalorder %s2041_s19, 0  ;;  %p86_p7 = scmp.eq.s32.totalorder %s2041_s19, 1 }
   0xf   : > { %s2057_s24 = scalar_select %p26_p1, %s1968_s17, %s28_s22  }
  0x10   : > { %p2059_p5 = por %p36_p2, %p35_p0  ;;  %p2065_p6 = por %p2740_p4, %p41_p3 }
  0x11   : > { %2751 = sst [smem:[#allocation24_spill]] %s2057_s24  ;;  %p92_p8 = scmp.eq.s32.totalorder %s1605_s20, 1 }
  0x12   : > { %s2753_s26 = scalar_select %p2065_p6, 1, 0 }
  0x13   : > { %p1606_p9 = scmp.ge.s32.totalorder %s1972_s18, 1  ;;  %p99_p10 = scmp.lt.s32.totalorder %s1972_s18, 3 }
  0x14   : > { %p2072_p11 = por %p86_p7, %p35_p0  ;;  %p2076_p12 = por %p92_p8, %p41_p3 }
  0x15   : > { %p2080_p13 = pnand %p1606_p9, %p99_p10  ;;  %s1974_s30 = smov [#allocation11]  }
  0x16   : > { %s2754_s27 = scalar_select %p2072_p11, 1, 0 }
  0x17   : > { %s2755_s28 = scalar_select %p2076_p12, 1, 0 }
  0x18   : > { %s2756_s29 = scalar_select %p2080_p13, 1, 0 }
  0x19   : > { %p1657_p4 = pneg %p2080_p13  ;;  %s112_s5 = sshll.u32 %s1974_s30, 4  ;;  %s113_s5 = int_to_ptr.vmem [resolvable:$true] %s112_s5 }
  0x1a   : > { %p1670_p0 = scmp.lt.s32.totalorder %s1972_s18, 2  ;;  %p2757_p7 = scmp.eq.s32.totalorder %s2041_s19, 0 }
  0x1b   : > { %s123_s7 = sand.u32 1, %s1968_s17   ;;  %s2760_s1 = sld [smem:[#allocation47_spill]] }
  0x1c   : > { %p2091_p6 = pnand %p1657_p4, %p2757_p7  ;;  %p2098_p3 = pnand %p1670_p0, %p2059_p5 }
  0x1d   : > { %s1609_s9 = sshll.u32 %s123_s7, 5 }
  0x1e   : > { %s2759_s8 = scalar_select %p2098_p3, 1, 0 }
  0x1f   : > { %p1842_p4 = pneg %p2091_p6 }
  0x21   : > { %s1840_s12 = scalar_lea.hbm %s2760_s1, 64 }
  0x22   : > { %p1841_p8 = scmp.ne.s32.totalorder %s2760_s1, %s1840_s12  ;;  %p1847_p5 = scmp.lt.u32.totalorder %s1840_s12, %s2760_s1 }
  0x24   : > { %p1843_p9 = pnand %p1842_p4, %p1841_p8 }
  0x26   : > { %p1844_p10 = pneg %p1843_p9 }
  0x28   : > { %p1849_p0 = pnand %p1847_p5, %p1844_p10 }
  0x2a   : > { %1852 = shalt.err (!%p1849_p0)
}
  0x2b   : > { %s1853_s23 = scalar_lea.vmem %s113_s5, 64  ;;  %p1861_p12 = scmp.lt.s32.totalorder %s113_s5, %s113_s5 }
  0x2c   : > { %p1854_p7 = scmp.ne.s32.totalorder %s113_s5, %s1853_s23  ;;  %p1862_p11 = scmp.lt.s32.totalorder %s1853_s23, %s1853_s23 }
  0x2e   : > { %p1856_p2 = pnand %p1854_p7, %p1842_p4  ;;  %p1863_p13 = por %p1862_p11, %p1861_p12 }
  0x30   : > { %p1857_p1 = pneg %p1856_p2 }
  0x32   : > { %p1864_p3 = pnand %p1863_p13, %p1857_p1 }
  0x34   : > { %1867 = shalt.err (!%p1864_p3)
}
  0x35   : > { %1660 = dma.hbm_to_vmem [thread:$0]  (!%p2091_p6), %s2760_s1, 64, %s113_s5, [#allocation12]  }
  0x36   : > { %s1647_s10 = sshll.u32 %s1972_s18, 9  ;;  %s127_s11 = scalar_lea.vmem [#allocation8], %s1609_s9 }
  0x37   : > { %s134_s12 = sshll.u32 %s127_s11, 4  ;;  %s2761_s0 = sld [smem:[#allocation46_spill]]  ;;  %s2124_s12 = int_to_ptr.vmem [resolvable:$true] %s134_s12 }
  0x38   : > { %s2126_s6 = scalar_lea.sflag [#allocation9], %s123_s7  ;;  %p2762_p12 = scmp.ne.s32.totalorder %s2759_s8, 0 }
  0x3a   : > { %p1870_p6 = pneg %p2762_p12 }
  0x3d   : > { %s2122_s20 = scalar_lea.hbm %s2761_s0, %s1647_s10  ;;  %s1873_s23 = scalar_lea.hbm %s2761_s0, 1024 }
  0x3e   : > { %s1868_s22 = scalar_lea.hbm %s2122_s20, 512  ;;  %p1874_p2 = scmp.lt.u32.totalorder %s2122_s20, %s2761_s0 }
  0x3f   : > { %p1869_p11 = scmp.ne.s32.totalorder %s2122_s20, %s1868_s22  ;;  %p1875_p3 = scmp.lt.u32.totalorder %s1873_s23, %s1868_s22 }
  0x40   : > { %p1877_p4 = scmp.lt.u32.totalorder %s1868_s22, %s2122_s20 }
  0x41   : > { %p1871_p13 = pnand %p1870_p6, %p1869_p11  ;;  %p1876_p8 = por %p1875_p3, %p1874_p2 }
  0x43   : > { %p1872_p1 = pneg %p1871_p13  ;;  %p1878_p9 = por %p1877_p4, %p1876_p8 }
  0x45   : > { %p1879_p10 = pnand %p1878_p9, %p1872_p1 }
  0x47   : > { %1882 = shalt.err (!%p1879_p10)
}
  0x48   : > { %s1883_s7 = scalar_lea.vmem %s2124_s12, 512  ;;  %s1975_s10 = smov [#allocation8]  }
  0x49   : > { %p1884_p5 = scmp.ne.s32.totalorder %s2124_s12, %s1883_s7  ;;  %s1888_s11 = sshll.u32 %s1975_s10, 4  ;;  %s1889_s11 = int_to_ptr.vmem [resolvable:$false] %s1888_s11 }
  0x4a   : > { %s1890_s13 = scalar_lea.vmem %s1889_s11, 1024  ;;  %p1891_p11 = scmp.lt.s32.totalorder %s2124_s12, %s1889_s11 }
  0x4b   : > { %p1886_p0 = pnand %p1884_p5, %p1870_p6  ;;  %p1892_p13 = scmp.lt.s32.totalorder %s1890_s13, %s1883_s7 }
  0x4d   : > { %p1887_p7 = pneg %p1886_p0  ;;  %p1893_p2 = por %p1892_p13, %p1891_p11 }
  0x4f   : > { %p1894_p3 = pnand %p1893_p2, %p1887_p7 }
  0x51   : > { %1897 = shalt.err (!%p1894_p3)
}
  0x52   : > { %s1976_s14 = smov 64   ;;  %s1977_s22 = smov 4  }
  0x53   : > { %1664 = dma.hbm_to_vmem [thread:$0]  (!%p2762_p12), %s2122_s20, 512, %s2124_s12, %s2126_s6, %s1976_s14, %s1976_s14, %s1977_s22  }
  0x54   : > { %p2763_p6 = scmp.ne.s32.totalorder %s2756_s29, 0 }
  0x56   : > { %146 = sbr.rel (%p2763_p6) target bundleno = 2198 (0x896), region = 28 }
  0x5d   : > { %s2157_s5 = sand.u32 1, %s1964_s16   ;;  %p2764_p1 = scmp.ne.s32.totalorder %s2753_s26, 0 }
  0x5e   : > { %s1613_s9 = sshll.u32 %s2157_s5, 5  ;;  %s149_s23 = scalar_lea.sflag [#allocation9], %s2157_s5 }
  0x5f   : > { %s2161_s25 = scalar_lea.vmem [#allocation8], %s1613_s9 }
  0x60   : > { %1943 = dma.done.wait (%p2764_p1), %s149_s23, 512  }
  0x61   : > { %1945 = vsyncadd (%p2764_p1), %s149_s23, 4294966784  ;;  %p2765_p12 = scmp.eq.s32.totalorder %s2041_s19, 0 }
  0x63   : > { %1947 = dma.done.wait (%p2765_p12), [#allocation12], 64   ;;  %p2766_p8 = pmov %p2765_p12 }
  0x64   : > { %s1615_s29 = sshll.u32 %s2157_s5, 6  ;;  %p2767_p4 = scmp.ne.s32.totalorder %s2041_s19, 0 }
  0x65   : > { %1949 = vsyncadd (%p2766_p8), [#allocation12], 4294967232  ;;  %s2172_s8 = scalar_lea.vmem [#allocation13], %s1615_s29 }
  0x66   : > { %183 = sbr.rel (%p2767_p4) target bundleno = 136 (0x88), region = 40 }
  0x6d   : > { %s188_s12 = sld [smem:[#allocation0]]   ;;  %s1978_s20 = smov [#allocation2]  }
  0x6e   : > { %s196_s6 = sshll.u32 %s1978_s20, 4  ;;  %s1979_s30 = smov 512   ;;  %s197_s6 = int_to_ptr.vmem [resolvable:$true] %s196_s6 }
  0x6f   : > { %200 = sst [smem:[#allocation15]] %s1979_s30  ;;  %s1980_s26 = smov 4  }
  0x70   : > { %202 = sst [smem:[#allocation15 + $0x1]] %s1979_s30  ;;  %s1981_s7 = smov 64  }
  0x71   : > { %204 = sst [smem:[#allocation15 + $0x2]] %s1980_s26  ;;  %s1982_s11 = smov 128  }
  0x72   : > { %206 = sst [smem:[#allocation15 + $0x3]] %s1981_s7  ;;  %s1983_s14 = smov 2  }
  0x73   : > { %s1617_s10 = sshll.u32 %s188_s12, 26  ;;  %208 = sst [smem:[#allocation15 + $0x4]] %s1982_s11 }
  0x74   : > { %s1618_s13 = sadd.s32 134217728, %s1617_s10  ;;  %210 = sst [smem:[#allocation15 + $0x5]] %s1983_s14 }
  0x75   : > { %s1984_s22 = smov 256   ;;  %214 = sst [smem:[#allocation15 + $0x7]] %s1981_s7 }
  0x76   : > { %212 = sst [smem:[#allocation15 + $0x6]] %s1984_s22  ;;  %s1985_s9 = smov [#allocation7]  }
  0x77   : > { %216 = sst [smem:[#allocation15 + $0x8]] %s1980_s26  ;;  %s1986_s23 = smov [#allocation14]  }
  0x78   : > { %218 = dma.general %s2737_s2, 1024, %s197_s6, %s1985_s9, %s1986_s23, [#allocation15], %s1618_s13, 0  }
  0x79   : > { %235 = sst [smem:[#allocation17]] %s1979_s30  ;;  %s1987_s0 = smov [#allocation3]  }
  0x7a   : > { %237 = sst [smem:[#allocation17 + $0x1]] %s1979_s30  ;;  %s231_s1 = sshll.u32 %s1987_s0, 4  ;;  %s232_s1 = int_to_ptr.vmem [resolvable:$true] %s231_s1 }
  0x7b   : > { %239 = sst [smem:[#allocation17 + $0x2]] %s1980_s26  ;;  %s1988_s12 = smov [#allocation7 + $0x1]  }
  0x7c   : > { %241 = sst [smem:[#allocation17 + $0x3]] %s1981_s7  ;;  %s1989_s10 = smov [#allocation16]  }
  0x7d   : > { %243 = sst [smem:[#allocation17 + $0x4]] %s1982_s11 }
  0x7e   : > { %245 = sst [smem:[#allocation17 + $0x5]] %s1983_s14 }
  0x7f   : > { %247 = sst [smem:[#allocation17 + $0x6]] %s1984_s22 }
  0x80   : > { %249 = sst [smem:[#allocation17 + $0x7]] %s1981_s7 }
  0x81   : > { %251 = sst [smem:[#allocation17 + $0x8]] %s1980_s26 }
  0x82   : > { %253 = dma.general %s2738_s3, 4096, %s232_s1, %s1988_s12, %s1989_s10, [#allocation17], %s1618_s13, 0  }
  0x83   : > { %1950 = dma.done.wait [#allocation7], 1024 }
  0x84   : > { %1951 = vsyncadd [#allocation7], 4294966272 }
  0x85   : > { %1952 = dma.done.wait [#allocation7 + $0x1], 4096 }
  0x86   : > { %1953 = vsyncadd [#allocation7 + $0x1], 4294963200  ;;  %v1990_v0 = vmov 0.0  }
  0x87   : > { %262 = vst [vmem:[#allocation5] sm:$0xff] %v1990_v0  ;;  %263 = vst [vmem:[#allocation6] sm:$0xff] %v1990_v0 }
  0x88 PF: > { %v273_v1 = vld [vmem:[#allocation2 + $0x8] sm:$0xff]  ;;  %v275_v2 = vld [vmem:[#allocation2 + $0x18] sm:$0xff]  ;;  %v272_v3 = vld [vmem:[#allocation2] sm:$0xff]  ;;  %v2746_v9 = vmov 0   ;;  %vm322_vm0 = vcmask 261120   ;;  %v282_v48 = vlaneseq  ;;  %s1648_s0 = sshll.u32 %s2041_s19, 10 }
  0x89   : > { %335 = vmatprep.subr.bf16.mxu0 %v273_v1  ;;  %408 = vmatprep.subr.bf16.mxu1 %v275_v2  ;;  %v274_v4 = vld [vmem:[#allocation2 + $0x10] sm:$0xff]  ;;  %v277_v5 = vld [vmem:[#allocation2 + $0x28] sm:$0xff]  ;;  %v279_v6 = vld [vmem:[#allocation2 + $0x38] sm:$0xff]  ;;  %s1502_s1 = sshll.u32 %s2172_s8, 4  ;;  %s1489_s6 = scalar_lea.sflag [#allocation10], %s2157_s5  ;;  %s2690_s1 = int_to_ptr.vmem [resolvable:$true] %s1502_s1 }
  0x8a   : > { %336 = vmatpush1.bf16.msra.mxu0 %v272_v3  ;;  %409 = vmatpush1.bf16.msra.mxu1 %v274_v4  ;;  %v276_v7 = vld [vmem:[#allocation2 + $0x20] sm:$0xff]  ;;  %v278_v8 = vld [vmem:[#allocation2 + $0x30] sm:$0xff]  ;;  %v2184_v10 = vld [vmem:[#allocation3 + $0x8] sm:$0xff]  ;;  %v283_v49 = vshrl.u32 %v282_v48, 7  ;;  %s1898_s30 = scalar_lea.vmem %s2690_s1, 1024  ;;  %p2811_p10 = scmp.ne.s32.totalorder %s2754_s27, 0 }
  0x8b   : > { %337 = vmatprep.subr.bf16.mxu0 %v277_v5  ;;  %410 = vmatprep.subr.bf16.mxu1 %v279_v6  ;;  %v2186_v11 = vld [vmem:[#allocation3 + $0x18] sm:$0xff]  ;;  %v1724_v12 = vld [vmem:[%s2161_s25] sm:$0xff]   ;;  %v2191_v13 = vld [vmem:[#allocation3] sm:$0xff]  ;;  %p1899_p9 = scmp.ne.s32.totalorder %s2690_s1, %s1898_s30  ;;  %s1992_s19 = smov [#allocation13]  }
  0x8c   : > { %367 = vmatprep.mubr.bf16.mxu0 %v2746_v9  ;;  %440 = vmatprep.mubr.bf16.mxu1 %v2746_v9  ;;  %v2193_v14 = vld [vmem:[#allocation3 + $0x10] sm:$0xff]  ;;  %v2195_v15 = vld [vmem:[#allocation3 + $0x28] sm:$0xff]  ;;  %v2197_v16 = vld [vmem:[#allocation3 + $0x38] sm:$0xff]  ;;  %v292_v50 = vsub.s32 2, %v283_v49  ;;  %v296_v51 = vsub.s32 3, %v283_v49  ;;  %v284_v52 = vsub.s32 0, %v283_v49 }
  0x8d   : > { %v2205_v17 = vld [vmem:[#allocation3 + $0x20] sm:$0xff]  ;;  %v2207_v18 = vld [vmem:[#allocation3 + $0x30] sm:$0xff]  ;;  %v2211_v19 = vld [vmem:[#allocation3 + $0x48] sm:$0xff]  ;;  %v288_v54 = vsub.s32 1, %v283_v49  ;;  %p1900_p5 = pnand %p1899_p9, %p2811_p10  ;;  %s1902_s26 = sshll.u32 %s1992_s19, 4  ;;  %s1903_s26 = int_to_ptr.vmem [resolvable:$false] %s1902_s26 }
  0x8e   : > { %338 = vmatpush1.bf16.msra.mxu0 %v276_v7  ;;  %411 = vmatpush1.bf16.msra.mxu1 %v278_v8  ;;  %v2213_v20 = vld [vmem:[#allocation3 + $0x58] sm:$0xff]  ;;  %v2220_v22 = vld [vmem:[#allocation3 + $0x40] sm:$0xff]  ;;  %v2222_v23 = vld [vmem:[#allocation3 + $0x50] sm:$0xff]  ;;  %s1904_s7 = scalar_lea.vmem %s1903_s26, 2048  ;;  %p1905_p7 = scmp.lt.s32.totalorder %s2690_s1, %s1903_s26 }
  0x8f   : > { %555 = vmatprep.subr.bf16.mxu0 %v2184_v10  ;;  %596 = vmatprep.subr.bf16.mxu1 %v2186_v11  ;;  %v1725_v21 = vld [vmem:[%s2161_s25 + $0x8] sm:$0xff]   ;;  %v2224_v24 = vld [vmem:[#allocation3 + $0x68] sm:$0xff]  ;;  %v2234_v26 = vld [vmem:[#allocation3 + $0x60] sm:$0xff]  ;;  %p1901_p0 = pneg %p1900_p5  ;;  %p1906_p11 = scmp.lt.s32.totalorder %s1904_s7, %s1898_s30 }
  0x90   : > { %v2226_v25 = vld [vmem:[#allocation3 + $0x78] sm:$0xff]  ;;  %v2236_v27 = vld [vmem:[#allocation3 + $0x70] sm:$0xff]  ;;  %v2240_v28 = vld [vmem:[#allocation3 + $0x88] sm:$0xff] }
  0x91   : > { %1625 = vmatmul.mubr.msk.bf16.vlgmr.msra.gmra.mrb[0].mxu0 %vm322_vm0, %v1724_v12  ;;  %1629 = vmatmul.mubr.msk.bf16.vlgmr.msra.gmra.mrb[0].mxu1 %vm322_vm0, %v1724_v12  ;;  %v2242_v29 = vld [vmem:[#allocation3 + $0x98] sm:$0xff]  ;;  %v1726_v30 = vld [vmem:[%s2161_s25 + $0x10] sm:$0xff]   ;;  %v2251_v32 = vld [vmem:[#allocation3 + $0x90] sm:$0xff]  ;;  %p1907_p13 = por %p1906_p11, %p1905_p7 }
  0x92   : > { %556 = vmatpush1.bf16.msra.mxu0 %v2191_v13  ;;  %597 = vmatpush1.bf16.msra.mxu1 %v2193_v14  ;;  %v2249_v31 = vld [vmem:[#allocation3 + $0x80] sm:$0xff]  ;;  %v2253_v33 = vld [vmem:[#allocation3 + $0xa8] sm:$0xff]  ;;  %v2255_v34 = vld [vmem:[#allocation3 + $0xb8] sm:$0xff] }
  0x93   : > { %557 = vmatprep.subr.bf16.mxu0 %v2195_v15  ;;  %598 = vmatprep.subr.bf16.mxu1 %v2197_v16  ;;  %v2263_v35 = vld [vmem:[#allocation3 + $0xa0] sm:$0xff]  ;;  %v2265_v36 = vld [vmem:[#allocation3 + $0xb0] sm:$0xff]  ;;  %v2269_v37 = vld [vmem:[#allocation3 + $0xc8] sm:$0xff]  ;;  %p1908_p2 = pnand %p1907_p13, %p1901_p0 }
  0x94   : > { %377 = vmatprep.mubr.bf16.mxu0 %v2746_v9  ;;  %450 = vmatprep.mubr.bf16.mxu1 %v2746_v9  ;;  %v2271_v38 = vld [vmem:[#allocation3 + $0xd8] sm:$0xff]  ;;  %v1727_v39 = vld [vmem:[%s2161_s25 + $0x18] sm:$0xff]   ;;  %v2278_v40 = vld [vmem:[#allocation3 + $0xc0] sm:$0xff]  ;;  %s2688_s25 = scalar_lea.hbm %s2739_s4, %s1648_s0 }
  0x95   : > { %v2280_v41 = vld [vmem:[#allocation3 + $0xd0] sm:$0xff]  ;;  %v2282_v42 = vld [vmem:[#allocation3 + $0xe8] sm:$0xff]  ;;  %v2284_v43 = vld [vmem:[#allocation3 + $0xf8] sm:$0xff] }
  0x96   : > { %558 = vmatpush1.bf16.msra.mxu0 %v2205_v17  ;;  %599 = vmatpush1.bf16.msra.mxu1 %v2207_v18  ;;  %v545_v44 = vld [vmem:[#allocation5] sm:$0xff]  ;;  %v2294_v46 = vld [vmem:[#allocation3 + $0xf0] sm:$0xff] }
  0x97   : > { %559 = vmatprep.subr.bf16.mxu0 %v2211_v19  ;;  %600 = vmatprep.subr.bf16.mxu1 %v2213_v20  ;;  %v2292_v45 = vld [vmem:[#allocation3 + $0xe0] sm:$0xff]  ;;  %v554_v47 = vpack.c.bf16 %v545_v44, %v545_v44  ;;  %v280_v53 = vld [vmem:[#allocation11] sm:$0xf] }
  0x98   : > { %v2336_v55 = vrot.slane %v280_v53, %v292_v50  ;;  %v2342_v58 = vrot.slane %v280_v53, %v296_v51  ;;  %v285_v59 = vrot.slane %v280_v53, %v284_v52  ;;  %v289_v62 = vrot.slane %v280_v53, %v288_v54 }
  0x99   : > { %1626 = vmatmul.mubr.msk.bf16.gmra.mrb[4].mxu0 %vm322_vm0, %v1725_v21  ;;  %1630 = vmatmul.mubr.msk.bf16.gmra.mrb[4].mxu1 %vm322_vm0, %v1725_v21 }
  0x9a   : > { %560 = vmatpush1.bf16.msra.mxu0 %v2220_v22  ;;  %601 = vmatpush1.bf16.msra.mxu1 %v2222_v23 }
  0x9b   : > { %561 = vmatprep.subr.bf16.mxu0 %v2224_v24  ;;  %602 = vmatprep.subr.bf16.mxu1 %v2226_v25 }
  0x9c   : > { %387 = vmatprep.mubr.bf16.mxu0 %v2746_v9  ;;  %460 = vmatprep.mubr.bf16.mxu1 %v2746_v9 }
  0x9e   : > { %562 = vmatpush1.bf16.msra.mxu0 %v2234_v26  ;;  %603 = vmatpush1.bf16.msra.mxu1 %v2236_v27 }
  0x9f   : > { %563 = vmatprep.subr.bf16.mxu0 %v2240_v28  ;;  %604 = vmatprep.subr.bf16.mxu1 %v2242_v29 }
  0xa1   : > { %1627 = vmatmul.mubr.msk.bf16.gmra.mrb[8].mxu0 %vm322_vm0, %v1726_v30  ;;  %1631 = vmatmul.mubr.msk.bf16.gmra.mrb[8].mxu1 %vm322_vm0, %v1726_v30 }
  0xa2   : > { %564 = vmatpush1.bf16.msra.mxu0 %v2249_v31  ;;  %605 = vmatpush1.bf16.msra.mxu1 %v2251_v32 }
  0xa3   : > { %565 = vmatprep.subr.bf16.mxu0 %v2253_v33  ;;  %606 = vmatprep.subr.bf16.mxu1 %v2255_v34 }
  0xa4   : > { %397 = vmatprep.mubr.bf16.mxu0 %v2746_v9  ;;  %470 = vmatprep.mubr.bf16.mxu1 %v2746_v9 }
  0xa6   : > { %566 = vmatpush1.bf16.msra.mxu0 %v2263_v35  ;;  %607 = vmatpush1.bf16.msra.mxu1 %v2265_v36 }
  0xa7   : > { %567 = vmatprep.subr.bf16.mxu0 %v2269_v37  ;;  %608 = vmatprep.subr.bf16.mxu1 %v2271_v38 }
  0xa9   : > { %1628 = vmatmul.mubr.msk.bf16.gmra.mrb[12].mxu0 %vm322_vm0, %v1727_v39  ;;  %1632 = vmatmul.mubr.msk.bf16.gmra.mrb[12].mxu1 %vm322_vm0, %v1727_v39 }
  0xaa   : > { %568 = vmatpush1.bf16.msra.mxu0 %v2278_v40  ;;  %609 = vmatpush1.bf16.msra.mxu1 %v2280_v41 }
  0xab   : > { %569 = vmatprep.subr.bf16.mxu0 %v2282_v42  ;;  %610 = vmatprep.subr.bf16.mxu1 %v2284_v43 }
  0xac   : > { %587 = vmatprep.mubr.bf16.mxu0 %v2746_v9  ;;  %628 = vmatprep.mubr.bf16.mxu1 %v2746_v9 }
  0xae   : > { %570 = vmatpush1.bf16.msra.mxu0 %v2292_v45  ;;  %611 = vmatpush1.bf16.msra.mxu1 %v2294_v46 }
  0xaf   : > { %672 = vmatprep.subr.bf16.mxu0 %v2184_v10  ;;  %713 = vmatprep.subr.bf16.mxu1 %v2186_v11 }
  0xb1   : > { %588 = vmatmul.mubr.bf16.vlgmr.msra.gmra.mrb[16].mxu0 %v554_v47  ;;  %629 = vmatmul.mubr.bf16.vlgmr.msra.gmra.mrb[16].mxu1 %v554_v47 }
  0xb2   : > { %673 = vmatpush1.bf16.msra.mxu0 %v2191_v13  ;;  %714 = vmatpush1.bf16.msra.mxu1 %v2193_v14 }
  0xb3   : > { %674 = vmatprep.subr.bf16.mxu0 %v2195_v15  ;;  %715 = vmatprep.subr.bf16.mxu1 %v2197_v16 }
  0xb4   : > { %704 = vmatprep.mubr.bf16.mxu0 %v2746_v9  ;;  %745 = vmatprep.mubr.bf16.mxu1 %v2746_v9 }
  0xb6   : > { %675 = vmatpush1.bf16.msra.mxu0 %v2205_v17  ;;  %716 = vmatpush1.bf16.msra.mxu1 %v2207_v18 }
  0xb7   : > { %676 = vmatprep.subr.bf16.mxu0 %v2211_v19  ;;  %717 = vmatprep.subr.bf16.mxu1 %v2213_v20 }
  0xba   : > { %677 = vmatpush1.bf16.msra.mxu0 %v2220_v22  ;;  %718 = vmatpush1.bf16.msra.mxu1 %v2222_v23 }
  0xbb   : > { %678 = vmatprep.subr.bf16.mxu0 %v2224_v24  ;;  %719 = vmatprep.subr.bf16.mxu1 %v2226_v25 }
  0xbe   : > { %679 = vmatpush1.bf16.msra.mxu0 %v2234_v26  ;;  %720 = vmatpush1.bf16.msra.mxu1 %v2236_v27 }
  0xbf   : > { %680 = vmatprep.subr.bf16.mxu0 %v2240_v28  ;;  %721 = vmatprep.subr.bf16.mxu1 %v2242_v29 }
  0xc2   : > { %681 = vmatpush1.bf16.msra.mxu0 %v2249_v31  ;;  %722 = vmatpush1.bf16.msra.mxu1 %v2251_v32 }
  0xc3   : > { %682 = vmatprep.subr.bf16.mxu0 %v2253_v33  ;;  %723 = vmatprep.subr.bf16.mxu1 %v2255_v34 }
  0xc6   : > { %683 = vmatpush1.bf16.msra.mxu0 %v2263_v35  ;;  %724 = vmatpush1.bf16.msra.mxu1 %v2265_v36 }
  0xc7   : > { %684 = vmatprep.subr.bf16.mxu0 %v2269_v37  ;;  %725 = vmatprep.subr.bf16.mxu1 %v2271_v38 }
  0xca   : > { %685 = vmatpush1.bf16.msra.mxu0 %v2278_v40  ;;  %726 = vmatpush1.bf16.msra.mxu1 %v2280_v41 }
  0xcb   : > { %686 = vmatprep.subr.bf16.mxu0 %v2282_v42  ;;  %727 = vmatprep.subr.bf16.mxu1 %v2284_v43 }
  0xce   : > { %687 = vmatpush1.bf16.msra.mxu0 %v2292_v45  ;;  %728 = vmatpush1.bf16.msra.mxu1 %v2294_v46 }
  0xcf   : > { %790 = vmatprep.subr.bf16.mxu0 %v2184_v10  ;;  %831 = vmatprep.subr.bf16.mxu1 %v2186_v11 }
 0x164   : > { %v2338_v56 = vpop.f32.mrb[0].mxu0  ;;  %v2340_v57 = vpop.f32.mrb[0].mxu1 }
 0x165   : > { %v371_v60 = vpop.f32.mrb[1].mxu0  ;;  %v444_v61 = vpop.f32.mrb[1].mxu1 }
 0x166   : > { %v373_v63 = vpop.f32.mrb[2].mxu0  ;;  %v446_v0 = vpop.f32.mrb[2].mxu1 }
 0x167   : > { %v2344_v1 = vadd.f32 %v373_v63, %v285_v59  ;;  %v375_v2 = vpop.f32.mrb[3].mxu0  ;;  %v2347_v3 = vadd.f32 %v446_v0, %v2336_v55  ;;  %v448_v4 = vpop.f32.mrb[3].mxu1 }
 0x168   : > { %v2349_v5 = vadd.f32 %v375_v2, %v289_v62  ;;  %v2352_v6 = vadd.f32 %v448_v4, %v2342_v58 }
 0x16c   : > { %v379_v7 = vpop.f32.mrb[4].mxu0  ;;  %v452_v8 = vpop.f32.mrb[4].mxu1 }
 0x16d   : > { %v2354_v12 = vadd.f32 %v379_v7, %v285_v59  ;;  %v381_v21 = vpop.f32.mrb[5].mxu0  ;;  %v2357_v30 = vadd.f32 %v452_v8, %v2336_v55  ;;  %v454_v39 = vpop.f32.mrb[5].mxu1 }
 0x16e   : > { %v2359_v44 = vadd.f32 %v381_v21, %v289_v62  ;;  %v383_v47 = vpop.f32.mrb[6].mxu0  ;;  %v2362_v48 = vadd.f32 %v454_v39, %v2342_v58  ;;  %v456_v49 = vpop.f32.mrb[6].mxu1 }
 0x16f   : > { %v2364_v50 = vadd.f32 %v383_v47, %v285_v59  ;;  %v385_v51 = vpop.f32.mrb[7].mxu0  ;;  %v2367_v52 = vadd.f32 %v456_v49, %v2336_v55  ;;  %v458_v53 = vpop.f32.mrb[7].mxu1 }
 0x170   : > { %2768 = vst [vmem:[#allocation25_spill] sm:$0xff] %v2362_v48  ;;  %v2369_v54 = vadd.f32 %v385_v51, %v289_v62  ;;  %v2372_v63 = vadd.f32 %v458_v53, %v2342_v58 }
 0x171   : > { %2769 = vst [vmem:[#allocation26_spill] sm:$0xff] %v2364_v50  ;;  %2770 = vst [vmem:[#allocation27_spill] sm:$0xff] %v2367_v52 }
 0x172   : > { %2771 = vst [vmem:[#allocation28_spill] sm:$0xff] %v2369_v54  ;;  %2772 = vst [vmem:[#allocation29_spill] sm:$0xff] %v2372_v63 }
 0x174   : > { %v389_v0 = vpop.f32.mrb[8].mxu0  ;;  %v462_v2 = vpop.f32.mrb[8].mxu1 }
 0x175   : > { %v2374_v4 = vadd.f32 %v389_v0, %v285_v59  ;;  %v391_v7 = vpop.f32.mrb[9].mxu0  ;;  %v2377_v8 = vadd.f32 %v462_v2, %v2336_v55  ;;  %v464_v21 = vpop.f32.mrb[9].mxu1 }
 0x176   : > { %v2379_v39 = vadd.f32 %v391_v7, %v289_v62  ;;  %v393_v47 = vpop.f32.mrb[10].mxu0  ;;  %v2382_v49 = vadd.f32 %v464_v21, %v2342_v58  ;;  %v466_v51 = vpop.f32.mrb[10].mxu1 }
 0x177   : > { %2773 = vst [vmem:[#allocation30_spill] sm:$0xff] %v2374_v4  ;;  %2774 = vst [vmem:[#allocation31_spill] sm:$0xff] %v2377_v8  ;;  %v2384_v9 = vadd.f32 %v393_v47, %v285_v59  ;;  %v395_v53 = vpop.f32.mrb[11].mxu0  ;;  %v2387_v63 = vadd.f32 %v466_v51, %v2336_v55  ;;  %v468_v0 = vpop.f32.mrb[11].mxu1 }
 0x178   : > { %2775 = vst [vmem:[#allocation32_spill] sm:$0xff] %v2379_v39  ;;  %2776 = vst [vmem:[#allocation33_spill] sm:$0xff] %v2382_v49  ;;  %v2389_v4 = vadd.f32 %v395_v53, %v289_v62  ;;  %v2392_v2 = vadd.f32 %v468_v0, %v2342_v58 }
 0x179   : > { %2777 = vst [vmem:[#allocation34_spill] sm:$0xff] %v2384_v9  ;;  %2778 = vst [vmem:[#allocation35_spill] sm:$0xff] %v2387_v63 }
 0x17a   : > { %2779 = vst [vmem:[#allocation36_spill] sm:$0xff] %v2389_v4  ;;  %2780 = vst [vmem:[#allocation37_spill] sm:$0xff] %v2392_v2 }
 0x17c   : > { %v399_v8 = vpop.f32.mrb[12].mxu0  ;;  %v472_v7 = vpop.f32.mrb[12].mxu1 }
 0x17d   : > { %v2394_v39 = vadd.f32 %v399_v8, %v285_v59  ;;  %v401_v54 = vpop.f32.mrb[13].mxu0  ;;  %v2397_v21 = vadd.f32 %v472_v7, %v2336_v55  ;;  %v474_v47 = vpop.f32.mrb[13].mxu1 }
 0x17e   : > { %v2399_v9 = vadd.f32 %v401_v54, %v289_v62  ;;  %v403_v49 = vpop.f32.mrb[14].mxu0  ;;  %v2402_v51 = vadd.f32 %v474_v47, %v2342_v58  ;;  %v476_v53 = vpop.f32.mrb[14].mxu1  ;;  %v370_v54 = vadd.f32 %v2338_v56, %v285_v59  ;;  %v372_v47 = vadd.f32 %v371_v60, %v289_v62 }
 0x17f   : > { %2781 = vst [vmem:[#allocation38_spill] sm:$0xff] %v2394_v39  ;;  %2782 = vst [vmem:[#allocation39_spill] sm:$0xff] %v2397_v21  ;;  %v2404_v4 = vadd.f32 %v403_v49, %v285_v59  ;;  %v405_v0 = vpop.f32.mrb[15].mxu0  ;;  %v2407_v2 = vadd.f32 %v476_v53, %v2336_v55  ;;  %v478_v8 = vpop.f32.mrb[15].mxu1 }
 0x180   : > { %2783 = vst [vmem:[#allocation40_spill] sm:$0xff] %v2399_v9  ;;  %2784 = vst [vmem:[#allocation41_spill] sm:$0xff] %v2402_v51  ;;  %v2409_v39 = vadd.f32 %v405_v0, %v289_v62  ;;  %v2412_v7 = vadd.f32 %v478_v8, %v2342_v58  ;;  %v443_v9 = vadd.f32 %v2340_v57, %v2336_v55 }
 0x181   : > { %2785 = vst [vmem:[#allocation42_spill] sm:$0xff] %v2404_v4  ;;  %2786 = vst [vmem:[#allocation43_spill] sm:$0xff] %v2407_v2  ;;  %v445_v51 = vadd.f32 %v444_v61, %v2342_v58  ;;  %v546_v61 = vld [vmem:[#allocation6] sm:$0xff] }
 0x182   : > { %2787 = vst [vmem:[#allocation44_spill] sm:$0xff] %v2409_v39  ;;  %2788 = vst [vmem:[#allocation45_spill] sm:$0xff] %v2412_v7 }
 0x184   : > { %v589_v49 = vpop.f32.mrb[16].mxu0  ;;  %v630_v4 = vpop.f32.mrb[16].mxu1 }
 0x185   : > { %v637_v21 = vadd.f32 %v589_v49, %v370_v54  ;;  %v639_v63 = vadd.f32 %v630_v4, %v443_v9  ;;  %v591_v53 = vpop.f32.mrb[17].mxu0  ;;  %v632_v2 = vpop.f32.mrb[17].mxu1  ;;  %v2789_v54 = vmov 0  }
 0x186   : > { %v638_v52 = vadd.f32 %v591_v53, %v372_v47  ;;  %v640_v0 = vadd.f32 %v632_v2, %v445_v51  ;;  %v593_v39 = vpop.f32.mrb[18].mxu0  ;;  %v634_v50 = vpop.f32.mrb[18].mxu1 }
 0x187   : > { %v641_v8 = vmul.f32 0.5, %v637_v21  ;;  %v594_v7 = vpop.f32.mrb[19].mxu0  ;;  %v635_v48 = vpop.f32.mrb[19].mxu1 }
 0x188   : > { %v645_v56 = vmul.f32 0.5, %v638_v52  ;;  %v650_v55 = vmul.f32 0.5, %v640_v0 }
 0x189   : > { %1728 = vtanh.f32 %v641_v8 }
 0x18a   : > { %1730 = vtanh.f32 %v645_v56 }
 0x18b   : > { %1732 = vtanh.f32 %v639_v63 }
 0x18c   : > { %1734 = vtanh.f32 %v650_v55 }
 0x193   : > { %v1729_v57 = vpop.eup %1728 }
 0x194   : > { %v1731_v58 = vpop.eup %1730  ;;  %v643_v59 = vadd.f32 1.0, %v1729_v57 }
 0x195   : > { %v647_v60 = vadd.f32 1.0, %v1731_v58  ;;  %v1733_v62 = vpop.eup %1732 }
 0x196   : > { %v644_v9 = vmul.f32 0.5, %v643_v59  ;;  %v1735_v48 = vpop.eup %1734 }
 0x197   : > { %v648_v4 = vmul.f32 0.5, %v647_v60  ;;  %v652_v52 = vadd.f32 1.0, %v1735_v48 }
 0x198   : > { %v655_v39 = vmul.f32 %v1733_v62, %v644_v9 }
 0x199   : > { %v654_v50 = vmul.f32 %v648_v4, %v546_v61  ;;  %v653_v63 = vmul.f32 0.5, %v652_v52 }
 0x19b   : > { %v2418_v2 = vadd.f32 %v655_v39, %v654_v50 }
 0x19d   : > { %1736 = vtanh.f32 %v2418_v2 }
 0x1a7   : > { %v1737_v21 = vpop.eup %1736 }
 0x1a8   : > { %v658_v51 = vmul.f32 %v1737_v21, %v653_v63 }
 0x1aa   : > { %661 = vst [vmem:[%s2172_s8] sm:$0xff] %v658_v51  ;;  %v671_v7 = vpack.c.bf16 %v658_v51, %v658_v51 }
 0x1ac   : > { %705 = vmatmul.mubr.bf16.vlgmr.msra.gmra.mrb[20].mxu0 %v671_v7  ;;  %746 = vmatmul.mubr.bf16.vlgmr.msra.gmra.mrb[20].mxu1 %v671_v7 }
 0x1ad   : > { %791 = vmatpush1.bf16.msra.mxu0 %v2191_v13  ;;  %832 = vmatpush1.bf16.msra.mxu1 %v2193_v14 }
 0x1ae   : > { %792 = vmatprep.subr.bf16.mxu0 %v2195_v15  ;;  %833 = vmatprep.subr.bf16.mxu1 %v2197_v16 }
 0x1af   : > { %822 = vmatprep.mubr.bf16.mxu0 %v2789_v54  ;;  %863 = vmatprep.mubr.bf16.mxu1 %v2789_v54 }
 0x1b1   : > { %793 = vmatpush1.bf16.msra.mxu0 %v2205_v17  ;;  %834 = vmatpush1.bf16.msra.mxu1 %v2207_v18 }
 0x1b2   : > { %794 = vmatprep.subr.bf16.mxu0 %v2211_v19  ;;  %835 = vmatprep.subr.bf16.mxu1 %v2213_v20 }
 0x1b5   : > { %795 = vmatpush1.bf16.msra.mxu0 %v2220_v22  ;;  %836 = vmatpush1.bf16.msra.mxu1 %v2222_v23 }
 0x1b6   : > { %796 = vmatprep.subr.bf16.mxu0 %v2224_v24  ;;  %837 = vmatprep.subr.bf16.mxu1 %v2226_v25 }
 0x1b9   : > { %797 = vmatpush1.bf16.msra.mxu0 %v2234_v26  ;;  %838 = vmatpush1.bf16.msra.mxu1 %v2236_v27 }
 0x1ba   : > { %798 = vmatprep.subr.bf16.mxu0 %v2240_v28  ;;  %839 = vmatprep.subr.bf16.mxu1 %v2242_v29 }
 0x1bd   : > { %799 = vmatpush1.bf16.msra.mxu0 %v2249_v31  ;;  %840 = vmatpush1.bf16.msra.mxu1 %v2251_v32 }
 0x1be   : > { %800 = vmatprep.subr.bf16.mxu0 %v2253_v33  ;;  %841 = vmatprep.subr.bf16.mxu1 %v2255_v34 }
 0x1c1   : > { %801 = vmatpush1.bf16.msra.mxu0 %v2263_v35  ;;  %842 = vmatpush1.bf16.msra.mxu1 %v2265_v36 }
 0x1c2   : > { %802 = vmatprep.subr.bf16.mxu0 %v2269_v37  ;;  %843 = vmatprep.subr.bf16.mxu1 %v2271_v38 }
 0x1c5   : > { %803 = vmatpush1.bf16.msra.mxu0 %v2278_v40  ;;  %844 = vmatpush1.bf16.msra.mxu1 %v2280_v41 }
 0x1c6   : > { %804 = vmatprep.subr.bf16.mxu0 %v2282_v42  ;;  %845 = vmatprep.subr.bf16.mxu1 %v2284_v43 }
 0x1c9   : > { %805 = vmatpush1.bf16.msra.mxu0 %v2292_v45  ;;  %846 = vmatpush1.bf16.msra.mxu1 %v2294_v46 }
 0x1ca   : > { %908 = vmatprep.subr.bf16.mxu0 %v2184_v10  ;;  %949 = vmatprep.subr.bf16.mxu1 %v2186_v11 }
 0x27f   : > { %v706_v47 = vpop.f32.mrb[20].mxu0  ;;  %v747_v49 = vpop.f32.mrb[20].mxu1 }
 0x280   : > { %v754_v53 = vadd.f32 %v706_v47, %v2344_v1  ;;  %v756_v0 = vadd.f32 %v747_v49, %v2347_v3  ;;  %v708_v8 = vpop.f32.mrb[21].mxu0  ;;  %v749_v56 = vpop.f32.mrb[21].mxu1 }
 0x281   : > { %v755_v55 = vadd.f32 %v708_v8, %v2349_v5  ;;  %v757_v57 = vadd.f32 %v749_v56, %v2352_v6  ;;  %v710_v58 = vpop.f32.mrb[22].mxu0  ;;  %v751_v59 = vpop.f32.mrb[22].mxu1 }
 0x282   : > { %v758_v60 = vmul.f32 0.5, %v754_v53  ;;  %v711_v9 = vpop.f32.mrb[23].mxu0  ;;  %v752_v61 = vpop.f32.mrb[23].mxu1 }
 0x283   : > { %v762_v62 = vmul.f32 0.5, %v755_v55  ;;  %v767_v4 = vmul.f32 0.5, %v757_v57 }
 0x284   : > { %1738 = vtanh.f32 %v758_v60  ;;  %v2790_v60 = vld [vmem:[#allocation25_spill] sm:$0xff] }
 0x285   : > { %1740 = vtanh.f32 %v762_v62 }
 0x286   : > { %1742 = vtanh.f32 %v756_v0 }
 0x287   : > { %1744 = vtanh.f32 %v767_v4 }
 0x28e   : > { %v1739_v39 = vpop.eup %1738 }
 0x28f   : > { %v1741_v1 = vpop.eup %1740  ;;  %v760_v3 = vadd.f32 1.0, %v1739_v39 }
 0x290   : > { %v764_v50 = vadd.f32 1.0, %v1741_v1  ;;  %v1743_v5 = vpop.eup %1742 }
 0x291   : > { %v761_v48 = vmul.f32 0.5, %v760_v3  ;;  %v1745_v51 = vpop.eup %1744 }
 0x292   : > { %v765_v52 = vmul.f32 0.5, %v764_v50  ;;  %v769_v7 = vadd.f32 1.0, %v1745_v51 }
 0x293   : > { %v772_v6 = vmul.f32 %v1743_v5, %v761_v48 }
 0x294   : > { %v771_v63 = vmul.f32 %v765_v52, %v2418_v2  ;;  %v770_v47 = vmul.f32 0.5, %v769_v7 }
 0x296   : > { %v2461_v21 = vadd.f32 %v772_v6, %v771_v63 }
 0x298   : > { %1746 = vtanh.f32 %v2461_v21 }
 0x2a2   : > { %v1747_v49 = vpop.eup %1746 }
 0x2a3   : > { %v775_v53 = vmul.f32 %v1747_v49, %v770_v47 }
 0x2a5   : > { %1633 = vst [vmem:[%s2172_s8 + $0x8] sm:$0xff] %v775_v53  ;;  %v789_v0 = vpack.c.bf16 %v775_v53, %v775_v53 }
 0x2a7   : > { %823 = vmatmul.mubr.bf16.vlgmr.msra.gmra.mrb[24].mxu0 %v789_v0  ;;  %864 = vmatmul.mubr.bf16.vlgmr.msra.gmra.mrb[24].mxu1 %v789_v0 }
 0x2a8   : > { %909 = vmatpush1.bf16.msra.mxu0 %v2191_v13  ;;  %950 = vmatpush1.bf16.msra.mxu1 %v2193_v14 }
 0x2a9   : > { %910 = vmatprep.subr.bf16.mxu0 %v2195_v15  ;;  %951 = vmatprep.subr.bf16.mxu1 %v2197_v16 }
 0x2aa   : > { %940 = vmatprep.mubr.bf16.mxu0 %v2789_v54  ;;  %981 = vmatprep.mubr.bf16.mxu1 %v2789_v54 }
 0x2ac   : > { %911 = vmatpush1.bf16.msra.mxu0 %v2205_v17  ;;  %952 = vmatpush1.bf16.msra.mxu1 %v2207_v18 }
 0x2ad   : > { %912 = vmatprep.subr.bf16.mxu0 %v2211_v19  ;;  %953 = vmatprep.subr.bf16.mxu1 %v2213_v20 }
 0x2b0   : > { %913 = vmatpush1.bf16.msra.mxu0 %v2220_v22  ;;  %954 = vmatpush1.bf16.msra.mxu1 %v2222_v23 }
 0x2b1   : > { %914 = vmatprep.subr.bf16.mxu0 %v2224_v24  ;;  %955 = vmatprep.subr.bf16.mxu1 %v2226_v25 }
 0x2b4   : > { %915 = vmatpush1.bf16.msra.mxu0 %v2234_v26  ;;  %956 = vmatpush1.bf16.msra.mxu1 %v2236_v27 }
 0x2b5   : > { %916 = vmatprep.subr.bf16.mxu0 %v2240_v28  ;;  %957 = vmatprep.subr.bf16.mxu1 %v2242_v29 }
 0x2b8   : > { %917 = vmatpush1.bf16.msra.mxu0 %v2249_v31  ;;  %958 = vmatpush1.bf16.msra.mxu1 %v2251_v32 }
 0x2b9   : > { %918 = vmatprep.subr.bf16.mxu0 %v2253_v33  ;;  %959 = vmatprep.subr.bf16.mxu1 %v2255_v34 }
 0x2bc   : > { %919 = vmatpush1.bf16.msra.mxu0 %v2263_v35  ;;  %960 = vmatpush1.bf16.msra.mxu1 %v2265_v36 }
 0x2bd   : > { %920 = vmatprep.subr.bf16.mxu0 %v2269_v37  ;;  %961 = vmatprep.subr.bf16.mxu1 %v2271_v38 }
 0x2c0   : > { %921 = vmatpush1.bf16.msra.mxu0 %v2278_v40  ;;  %962 = vmatpush1.bf16.msra.mxu1 %v2280_v41 }
 0x2c1   : > { %922 = vmatprep.subr.bf16.mxu0 %v2282_v42  ;;  %963 = vmatprep.subr.bf16.mxu1 %v2284_v43 }
 0x2c4   : > { %923 = vmatpush1.bf16.msra.mxu0 %v2292_v45  ;;  %964 = vmatpush1.bf16.msra.mxu1 %v2294_v46 }
 0x2c5   : > { %1026 = vmatprep.subr.bf16.mxu0 %v2184_v10  ;;  %1067 = vmatprep.subr.bf16.mxu1 %v2186_v11 }
 0x37a   : > { %v824_v2 = vpop.f32.mrb[24].mxu0  ;;  %v865_v8 = vpop.f32.mrb[24].mxu1 }
 0x37b   : > { %v872_v56 = vadd.f32 %v824_v2, %v2354_v12  ;;  %v874_v55 = vadd.f32 %v865_v8, %v2357_v30  ;;  %v826_v57 = vpop.f32.mrb[25].mxu0  ;;  %v867_v58 = vpop.f32.mrb[25].mxu1 }
 0x37c   : > { %v873_v59 = vadd.f32 %v826_v57, %v2359_v44  ;;  %v875_v9 = vadd.f32 %v867_v58, %v2790_v60  ;;  %v828_v61 = vpop.f32.mrb[26].mxu0  ;;  %v869_v62 = vpop.f32.mrb[26].mxu1  ;;  %v2792_v58 = vld [vmem:[#allocation27_spill] sm:$0xff] }
 0x37d   : > { %v876_v4 = vmul.f32 0.5, %v872_v56  ;;  %v829_v39 = vpop.f32.mrb[27].mxu0  ;;  %v870_v1 = vpop.f32.mrb[27].mxu1  ;;  %v2793_v61 = vld [vmem:[#allocation28_spill] sm:$0xff] }
 0x37e   : > { %v880_v3 = vmul.f32 0.5, %v873_v59  ;;  %v885_v50 = vmul.f32 0.5, %v875_v9 }
 0x37f   : > { %1748 = vtanh.f32 %v876_v4  ;;  %v2794_v4 = vld [vmem:[#allocation29_spill] sm:$0xff] }
 0x380   : > { %1750 = vtanh.f32 %v880_v3 }
 0x381   : > { %1752 = vtanh.f32 %v874_v55  ;;  %v2791_v55 = vld [vmem:[#allocation26_spill] sm:$0xff] }
 0x382   : > { %1754 = vtanh.f32 %v885_v50 }
 0x389   : > { %v1749_v48 = vpop.eup %1748 }
 0x38a   : > { %v1751_v12 = vpop.eup %1750  ;;  %v878_v30 = vadd.f32 1.0, %v1749_v48 }
 0x38b   : > { %v882_v5 = vadd.f32 1.0, %v1751_v12  ;;  %v1753_v44 = vpop.eup %1752 }
 0x38c   : > { %v879_v52 = vmul.f32 0.5, %v878_v30  ;;  %v1755_v47 = vpop.eup %1754 }
 0x38d   : > { %v883_v6 = vmul.f32 0.5, %v882_v5  ;;  %v887_v49 = vadd.f32 1.0, %v1755_v47 }
 0x38e   : > { %v890_v63 = vmul.f32 %v1753_v44, %v879_v52 }
 0x38f   : > { %v889_v51 = vmul.f32 %v883_v6, %v2461_v21  ;;  %v888_v53 = vmul.f32 0.5, %v887_v49 }
 0x391   : > { %v2504_v7 = vadd.f32 %v890_v63, %v889_v51 }
 0x393   : > { %1756 = vtanh.f32 %v2504_v7 }
 0x39d   : > { %v1757_v0 = vpop.eup %1756 }
 0x39e   : > { %v893_v2 = vmul.f32 %v1757_v0, %v888_v53 }
 0x3a0   : > { %1634 = vst [vmem:[%s2172_s8 + $0x10] sm:$0xff] %v893_v2  ;;  %v907_v8 = vpack.c.bf16 %v893_v2, %v893_v2 }
 0x3a2   : > { %941 = vmatmul.mubr.bf16.vlgmr.msra.gmra.mrb[28].mxu0 %v907_v8  ;;  %982 = vmatmul.mubr.bf16.vlgmr.msra.gmra.mrb[28].mxu1 %v907_v8 }
 0x3a3   : > { %1027 = vmatpush1.bf16.msra.mxu0 %v2191_v13  ;;  %1068 = vmatpush1.bf16.msra.mxu1 %v2193_v14 }
 0x3a4   : > { %1028 = vmatprep.subr.bf16.mxu0 %v2195_v15  ;;  %1069 = vmatprep.subr.bf16.mxu1 %v2197_v16 }
 0x3a5   : > { %1058 = vmatprep.mubr.bf16.mxu0 %v2789_v54  ;;  %1099 = vmatprep.mubr.bf16.mxu1 %v2789_v54 }
 0x3a7   : > { %1029 = vmatpush1.bf16.msra.mxu0 %v2205_v17  ;;  %1070 = vmatpush1.bf16.msra.mxu1 %v2207_v18 }
 0x3a8   : > { %1030 = vmatprep.subr.bf16.mxu0 %v2211_v19  ;;  %1071 = vmatprep.subr.bf16.mxu1 %v2213_v20 }
 0x3ab   : > { %1031 = vmatpush1.bf16.msra.mxu0 %v2220_v22  ;;  %1072 = vmatpush1.bf16.msra.mxu1 %v2222_v23 }
 0x3ac   : > { %1032 = vmatprep.subr.bf16.mxu0 %v2224_v24  ;;  %1073 = vmatprep.subr.bf16.mxu1 %v2226_v25 }
 0x3af   : > { %1033 = vmatpush1.bf16.msra.mxu0 %v2234_v26  ;;  %1074 = vmatpush1.bf16.msra.mxu1 %v2236_v27 }
 0x3b0   : > { %1034 = vmatprep.subr.bf16.mxu0 %v2240_v28  ;;  %1075 = vmatprep.subr.bf16.mxu1 %v2242_v29 }
 0x3b3   : > { %1035 = vmatpush1.bf16.msra.mxu0 %v2249_v31  ;;  %1076 = vmatpush1.bf16.msra.mxu1 %v2251_v32 }
 0x3b4   : > { %1036 = vmatprep.subr.bf16.mxu0 %v2253_v33  ;;  %1077 = vmatprep.subr.bf16.mxu1 %v2255_v34 }
 0x3b7   : > { %1037 = vmatpush1.bf16.msra.mxu0 %v2263_v35  ;;  %1078 = vmatpush1.bf16.msra.mxu1 %v2265_v36 }
 0x3b8   : > { %1038 = vmatprep.subr.bf16.mxu0 %v2269_v37  ;;  %1079 = vmatprep.subr.bf16.mxu1 %v2271_v38 }
 0x3bb   : > { %1039 = vmatpush1.bf16.msra.mxu0 %v2278_v40  ;;  %1080 = vmatpush1.bf16.msra.mxu1 %v2280_v41 }
 0x3bc   : > { %1040 = vmatprep.subr.bf16.mxu0 %v2282_v42  ;;  %1081 = vmatprep.subr.bf16.mxu1 %v2284_v43 }
 0x3bf   : > { %1041 = vmatpush1.bf16.msra.mxu0 %v2292_v45  ;;  %1082 = vmatpush1.bf16.msra.mxu1 %v2294_v46 }
 0x3c0   : > { %1144 = vmatprep.subr.bf16.mxu0 %v2184_v10  ;;  %1185 = vmatprep.subr.bf16.mxu1 %v2186_v11 }
 0x475   : > { %v942_v21 = vpop.f32.mrb[28].mxu0  ;;  %v983_v56 = vpop.f32.mrb[28].mxu1 }
 0x476   : > { %v990_v57 = vadd.f32 %v942_v21, %v2791_v55  ;;  %v992_v59 = vadd.f32 %v983_v56, %v2792_v58  ;;  %v944_v60 = vpop.f32.mrb[29].mxu0  ;;  %v985_v9 = vpop.f32.mrb[29].mxu1 }
 0x477   : > { %v991_v62 = vadd.f32 %v944_v60, %v2793_v61  ;;  %v993_v39 = vadd.f32 %v985_v9, %v2794_v4  ;;  %v946_v1 = vpop.f32.mrb[30].mxu0  ;;  %v987_v3 = vpop.f32.mrb[30].mxu1 }
 0x478   : > { %v994_v50 = vmul.f32 0.5, %v990_v57  ;;  %v947_v48 = vpop.f32.mrb[31].mxu0  ;;  %v988_v12 = vpop.f32.mrb[31].mxu1 }
 0x479   : > { %v998_v30 = vmul.f32 0.5, %v991_v62  ;;  %v1003_v5 = vmul.f32 0.5, %v993_v39 }
 0x47a   : > { %1758 = vtanh.f32 %v994_v50 }
 0x47b   : > { %1760 = vtanh.f32 %v998_v30 }
 0x47c   : > { %1762 = vtanh.f32 %v992_v59 }
 0x47d   : > { %1764 = vtanh.f32 %v1003_v5 }
 0x484   : > { %v1759_v52 = vpop.eup %1758 }
 0x485   : > { %v1761_v44 = vpop.eup %1760  ;;  %v996_v6 = vadd.f32 1.0, %v1759_v52 }
 0x486   : > { %v1000_v63 = vadd.f32 1.0, %v1761_v44  ;;  %v1763_v47 = vpop.eup %1762 }
 0x487   : > { %v997_v51 = vmul.f32 0.5, %v996_v6  ;;  %v1765_v8 = vpop.eup %1764 }
 0x488   : > { %v1001_v49 = vmul.f32 0.5, %v1000_v63  ;;  %v1005_v21 = vadd.f32 1.0, %v1765_v8  ;;  %v2608_v8 = vld [vmem:[#allocation3 + $0x20] sm:$0xff] }
 0x489   : > { %v1008_v53 = vmul.f32 %v1763_v47, %v997_v51 }
 0x48a   : > { %v1007_v0 = vmul.f32 %v1001_v49, %v2504_v7  ;;  %v1006_v56 = vmul.f32 0.5, %v1005_v21  ;;  %v2594_v49 = vld [vmem:[#allocation3] sm:$0xff]  ;;  %v2611_v21 = vld [vmem:[#allocation3 + $0x30] sm:$0xff] }
 0x48c   : > { %v2547_v2 = vadd.f32 %v1008_v53, %v1007_v0  ;;  %v2597_v53 = vld [vmem:[#allocation3 + $0x10] sm:$0xff]  ;;  %v2600_v0 = vld [vmem:[#allocation3 + $0x28] sm:$0xff] }
 0x48e   : > { %1766 = vtanh.f32 %v2547_v2 }
 0x498   : > { %v1767_v55 = vpop.eup %1766 }
 0x499   : > { %v1011_v57 = vmul.f32 %v1767_v55, %v1006_v56  ;;  %v2614_v56 = vld [vmem:[#allocation3 + $0x48] sm:$0xff]  ;;  %v2617_v55 = vld [vmem:[#allocation3 + $0x58] sm:$0xff] }
 0x49b   : > { %1635 = vst [vmem:[%s2172_s8 + $0x18] sm:$0xff] %v1011_v57  ;;  %v1025_v58 = vpack.c.bf16 %v1011_v57, %v1011_v57  ;;  %v2620_v57 = vld [vmem:[#allocation3 + $0x40] sm:$0xff] }
 0x49d   : > { %1059 = vmatmul.mubr.bf16.vlgmr.msra.gmra.mrb[32].mxu0 %v1025_v58  ;;  %1100 = vmatmul.mubr.bf16.vlgmr.msra.gmra.mrb[32].mxu1 %v1025_v58  ;;  %v2623_v58 = vld [vmem:[#allocation3 + $0x50] sm:$0xff] }
 0x49e   : > { %1145 = vmatpush1.bf16.msra.mxu0 %v2191_v13  ;;  %1186 = vmatpush1.bf16.msra.mxu1 %v2193_v14 }
 0x49f   : > { %1146 = vmatprep.subr.bf16.mxu0 %v2195_v15  ;;  %1187 = vmatprep.subr.bf16.mxu1 %v2197_v16  ;;  %v2795_v15 = vld [vmem:[#allocation30_spill] sm:$0xff] }
 0x4a0   : > { %1176 = vmatprep.mubr.bf16.mxu0 %v2789_v54  ;;  %1217 = vmatprep.mubr.bf16.mxu1 %v2789_v54 }
 0x4a2   : > { %1147 = vmatpush1.bf16.msra.mxu0 %v2205_v17  ;;  %1188 = vmatpush1.bf16.msra.mxu1 %v2207_v18  ;;  %v2796_v17 = vld [vmem:[#allocation31_spill] sm:$0xff] }
 0x4a3   : > { %1148 = vmatprep.subr.bf16.mxu0 %v2211_v19  ;;  %1189 = vmatprep.subr.bf16.mxu1 %v2213_v20 }
 0x4a6   : > { %1149 = vmatpush1.bf16.msra.mxu0 %v2220_v22  ;;  %1190 = vmatpush1.bf16.msra.mxu1 %v2222_v23  ;;  %v2797_v22 = vld [vmem:[#allocation32_spill] sm:$0xff] }
 0x4a7   : > { %1150 = vmatprep.subr.bf16.mxu0 %v2224_v24  ;;  %1191 = vmatprep.subr.bf16.mxu1 %v2226_v25  ;;  %v2798_v24 = vld [vmem:[#allocation33_spill] sm:$0xff] }
 0x4aa   : > { %1151 = vmatpush1.bf16.msra.mxu0 %v2234_v26  ;;  %1192 = vmatpush1.bf16.msra.mxu1 %v2236_v27 }
 0x4ab   : > { %1152 = vmatprep.subr.bf16.mxu0 %v2240_v28  ;;  %1193 = vmatprep.subr.bf16.mxu1 %v2242_v29 }
 0x4ae   : > { %1153 = vmatpush1.bf16.msra.mxu0 %v2249_v31  ;;  %1194 = vmatpush1.bf16.msra.mxu1 %v2251_v32 }
 0x4af   : > { %1154 = vmatprep.subr.bf16.mxu0 %v2253_v33  ;;  %1195 = vmatprep.subr.bf16.mxu1 %v2255_v34 }
 0x4b2   : > { %1155 = vmatpush1.bf16.msra.mxu0 %v2263_v35  ;;  %1196 = vmatpush1.bf16.msra.mxu1 %v2265_v36 }
 0x4b3   : > { %1156 = vmatprep.subr.bf16.mxu0 %v2269_v37  ;;  %1197 = vmatprep.subr.bf16.mxu1 %v2271_v38 }
 0x4b6   : > { %1157 = vmatpush1.bf16.msra.mxu0 %v2278_v40  ;;  %1198 = vmatpush1.bf16.msra.mxu1 %v2280_v41 }
 0x4b7   : > { %1158 = vmatprep.subr.bf16.mxu0 %v2282_v42  ;;  %1199 = vmatprep.subr.bf16.mxu1 %v2284_v43 }
 0x4ba   : > { %1159 = vmatpush1.bf16.msra.mxu0 %v2292_v45  ;;  %1200 = vmatpush1.bf16.msra.mxu1 %v2294_v46 }
 0x4bb   : > { %1262 = vmatprep.subr.bf16.mxu0 %v2184_v10  ;;  %1303 = vmatprep.subr.bf16.mxu1 %v2186_v11 }
 0x570   : > { %v1060_v13 = vpop.f32.mrb[32].mxu0  ;;  %v1101_v14 = vpop.f32.mrb[32].mxu1 }
 0x571   : > { %v1108_v16 = vadd.f32 %v1060_v13, %v2795_v15  ;;  %v1110_v18 = vadd.f32 %v1101_v14, %v2796_v17  ;;  %v1062_v19 = vpop.f32.mrb[33].mxu0  ;;  %v1103_v20 = vpop.f32.mrb[33].mxu1  ;;  %v2626_v13 = vld [vmem:[#allocation3 + $0x68] sm:$0xff]  ;;  %v2629_v14 = vld [vmem:[#allocation3 + $0x78] sm:$0xff] }
 0x572   : > { %v1109_v23 = vadd.f32 %v1062_v19, %v2797_v22  ;;  %v1111_v25 = vadd.f32 %v1103_v20, %v2798_v24  ;;  %v1064_v7 = vpop.f32.mrb[34].mxu0  ;;  %v1105_v59 = vpop.f32.mrb[34].mxu1 }
 0x573   : > { %v1112_v60 = vmul.f32 0.5, %v1108_v16  ;;  %v1065_v9 = vpop.f32.mrb[35].mxu0  ;;  %v1106_v61 = vpop.f32.mrb[35].mxu1 }
 0x574   : > { %v1116_v10 = vmul.f32 0.5, %v1109_v23  ;;  %v1121_v11 = vmul.f32 0.5, %v1111_v25 }
 0x575   : > { %1768 = vtanh.f32 %v1112_v60 }
 0x576   : > { %1770 = vtanh.f32 %v1116_v10 }
 0x577   : > { %1772 = vtanh.f32 %v1110_v18 }
 0x578   : > { %1774 = vtanh.f32 %v1121_v11 }
 0x57f   : > { %v1769_v62 = vpop.eup %1768 }
 0x580   : > { %v1771_v4 = vpop.eup %1770  ;;  %v1114_v39 = vadd.f32 1.0, %v1769_v62 }
 0x581   : > { %v1118_v1 = vadd.f32 1.0, %v1771_v4  ;;  %v1773_v50 = vpop.eup %1772 }
 0x582   : > { %v1115_v3 = vmul.f32 0.5, %v1114_v39  ;;  %v1775_v52 = vpop.eup %1774  ;;  %v1822_v39 = vld [vmem:[#allocation3 + $0x60] sm:$0xff] }
 0x583   : > { %v1119_v48 = vmul.f32 0.5, %v1118_v1  ;;  %v1123_v44 = vadd.f32 1.0, %v1775_v52  ;;  %v1823_v1 = vld [vmem:[#allocation3 + $0x70] sm:$0xff] }
 0x584   : > { %v1126_v12 = vmul.f32 %v1773_v50, %v1115_v3  ;;  %v1825_v3 = vld [vmem:[#allocation3 + $0x98] sm:$0xff]  ;;  %v1826_v50 = vld [vmem:[#allocation3 + $0x80] sm:$0xff]  ;;  %v1831_v52 = vld [vmem:[#allocation3 + $0xb0] sm:$0xff] }
 0x585   : > { %v1125_v30 = vmul.f32 %v1119_v48, %v2547_v2  ;;  %v1124_v6 = vmul.f32 0.5, %v1123_v44  ;;  %v2603_v2 = vld [vmem:[#allocation3 + $0x38] sm:$0xff]  ;;  %v1827_v48 = vld [vmem:[#allocation3 + $0x90] sm:$0xff]  ;;  %v1832_v44 = vld [vmem:[#allocation3 + $0xc8] sm:$0xff] }
 0x587   : > { %v2590_v5 = vadd.f32 %v1126_v12, %v1125_v30  ;;  %v1828_v12 = vld [vmem:[#allocation3 + $0xa8] sm:$0xff]  ;;  %v1829_v30 = vld [vmem:[#allocation3 + $0xb8] sm:$0xff] }
 0x589   : > { %1776 = vtanh.f32 %v2590_v5 }
 0x593   : > { %v1777_v63 = vpop.eup %1776 }
 0x594   : > { %v1129_v51 = vmul.f32 %v1777_v63, %v1124_v6  ;;  %v1833_v6 = vld [vmem:[#allocation3 + $0xd8] sm:$0xff]  ;;  %v1834_v63 = vld [vmem:[#allocation3 + $0xc0] sm:$0xff] }
 0x596   : > { %1636 = vst [vmem:[%s2172_s8 + $0x20] sm:$0xff] %v1129_v51  ;;  %v1143_v47 = vpack.c.bf16 %v1129_v51, %v1129_v51  ;;  %v1835_v51 = vld [vmem:[#allocation3 + $0xd0] sm:$0xff] }
 0x598   : > { %1177 = vmatmul.mubr.bf16.vlgmr.msra.gmra.mrb[36].mxu0 %v1143_v47  ;;  %1218 = vmatmul.mubr.bf16.vlgmr.msra.gmra.mrb[36].mxu1 %v1143_v47  ;;  %v1836_v47 = vld [vmem:[#allocation3 + $0xe8] sm:$0xff] }
 0x599   : > { %1263 = vmatpush1.bf16.msra.mxu0 %v2594_v49  ;;  %1304 = vmatpush1.bf16.msra.mxu1 %v2597_v53 }
 0x59a   : > { %1264 = vmatprep.subr.bf16.mxu0 %v2600_v0  ;;  %1305 = vmatprep.subr.bf16.mxu1 %v2603_v2 }
 0x59b   : > { %1294 = vmatprep.mubr.bf16.mxu0 %v2789_v54  ;;  %1335 = vmatprep.mubr.bf16.mxu1 %v2789_v54 }
 0x59d   : > { %1265 = vmatpush1.bf16.msra.mxu0 %v2608_v8  ;;  %1306 = vmatpush1.bf16.msra.mxu1 %v2611_v21 }
 0x59e   : > { %1266 = vmatprep.subr.bf16.mxu0 %v2614_v56  ;;  %1307 = vmatprep.subr.bf16.mxu1 %v2617_v55 }
 0x5a1   : > { %1267 = vmatpush1.bf16.msra.mxu0 %v2620_v57  ;;  %1308 = vmatpush1.bf16.msra.mxu1 %v2623_v58 }
 0x5a2   : > { %1268 = vmatprep.subr.bf16.mxu0 %v2626_v13  ;;  %1309 = vmatprep.subr.bf16.mxu1 %v2629_v14 }
 0x5a5   : > { %1269 = vmatpush1.bf16.msra.mxu0 %v2234_v26  ;;  %1310 = vmatpush1.bf16.msra.mxu1 %v2236_v27  ;;  %v1820_v26 = vld [vmem:[#allocation3 + $0x8] sm:$0xff]  ;;  %v1821_v27 = vld [vmem:[#allocation3 + $0x18] sm:$0xff] }
 0x5a6   : > { %1270 = vmatprep.subr.bf16.mxu0 %v2240_v28  ;;  %1311 = vmatprep.subr.bf16.mxu1 %v2242_v29 }
 0x5a9   : > { %1271 = vmatpush1.bf16.msra.mxu0 %v2249_v31  ;;  %1312 = vmatpush1.bf16.msra.mxu1 %v2251_v32  ;;  %v2799_v31 = vld [vmem:[#allocation34_spill] sm:$0xff] }
 0x5aa   : > { %1272 = vmatprep.subr.bf16.mxu0 %v2253_v33  ;;  %1313 = vmatprep.subr.bf16.mxu1 %v2255_v34  ;;  %v2800_v33 = vld [vmem:[#allocation35_spill] sm:$0xff] }
 0x5ad   : > { %1273 = vmatpush1.bf16.msra.mxu0 %v2263_v35  ;;  %1314 = vmatpush1.bf16.msra.mxu1 %v2265_v36 }
 0x5ae   : > { %1274 = vmatprep.subr.bf16.mxu0 %v2269_v37  ;;  %1315 = vmatprep.subr.bf16.mxu1 %v2271_v38  ;;  %v2801_v37 = vld [vmem:[#allocation36_spill] sm:$0xff] }
 0x5b1   : > { %1275 = vmatpush1.bf16.msra.mxu0 %v2278_v40  ;;  %1316 = vmatpush1.bf16.msra.mxu1 %v2280_v41  ;;  %v2802_v40 = vld [vmem:[#allocation37_spill] sm:$0xff] }
 0x5b2   : > { %1276 = vmatprep.subr.bf16.mxu0 %v2282_v42  ;;  %1317 = vmatprep.subr.bf16.mxu1 %v2284_v43 }
 0x5b5   : > { %1277 = vmatpush1.bf16.msra.mxu0 %v2292_v45  ;;  %1318 = vmatpush1.bf16.msra.mxu1 %v2294_v46 }
 0x5b6   : > { %1380 = vmatprep.subr.bf16.mxu0 %v1820_v26  ;;  %1421 = vmatprep.subr.bf16.mxu1 %v1821_v27  ;;  %v2806_v27 = vld [vmem:[#allocation41_spill] sm:$0xff] }
 0x66b   : > { %v1178_v28 = vpop.f32.mrb[36].mxu0  ;;  %v1219_v29 = vpop.f32.mrb[36].mxu1 }
 0x66c   : > { %v1226_v32 = vadd.f32 %v1178_v28, %v2799_v31  ;;  %v1228_v34 = vadd.f32 %v1219_v29, %v2800_v33  ;;  %v1180_v35 = vpop.f32.mrb[37].mxu0  ;;  %v1221_v36 = vpop.f32.mrb[37].mxu1 }
 0x66d   : > { %v1227_v38 = vadd.f32 %v1180_v35, %v2801_v37  ;;  %v1229_v41 = vadd.f32 %v1221_v36, %v2802_v40  ;;  %v1182_v42 = vpop.f32.mrb[38].mxu0  ;;  %v1223_v43 = vpop.f32.mrb[38].mxu1 }
 0x66e   : > { %v1230_v45 = vmul.f32 0.5, %v1226_v32  ;;  %v1183_v46 = vpop.f32.mrb[39].mxu0  ;;  %v1224_v15 = vpop.f32.mrb[39].mxu1 }
 0x66f   : > { %v1234_v16 = vmul.f32 0.5, %v1227_v38  ;;  %v1239_v17 = vmul.f32 0.5, %v1229_v41 }
 0x670   : > { %1778 = vtanh.f32 %v1230_v45 }
 0x671   : > { %1780 = vtanh.f32 %v1234_v16 }
 0x672   : > { %1782 = vtanh.f32 %v1228_v34 }
 0x673   : > { %1784 = vtanh.f32 %v1239_v17 }
 0x67a   : > { %v1779_v18 = vpop.eup %1778 }
 0x67b   : > { %v1781_v19 = vpop.eup %1780  ;;  %v1232_v20 = vadd.f32 1.0, %v1779_v18 }
 0x67c   : > { %v1236_v22 = vadd.f32 1.0, %v1781_v19  ;;  %v1783_v24 = vpop.eup %1782 }
 0x67d   : > { %v1233_v23 = vmul.f32 0.5, %v1232_v20  ;;  %v1785_v9 = vpop.eup %1784 }
 0x67e   : > { %v1237_v25 = vmul.f32 0.5, %v1236_v22  ;;  %v1241_v61 = vadd.f32 1.0, %v1785_v9  ;;  %v2808_v9 = vld [vmem:[#allocation43_spill] sm:$0xff] }
 0x67f   : > { %v1244_v7 = vmul.f32 %v1783_v24, %v1233_v23 }
 0x680   : > { %v1243_v59 = vmul.f32 %v1237_v25, %v2590_v5  ;;  %v1242_v10 = vmul.f32 0.5, %v1241_v61  ;;  %v1830_v5 = vld [vmem:[#allocation3 + $0xa0] sm:$0xff] }
 0x682   : > { %v2655_v60 = vadd.f32 %v1244_v7, %v1243_v59  ;;  %v2807_v7 = vld [vmem:[#allocation42_spill] sm:$0xff] }
 0x684   : > { %1786 = vtanh.f32 %v2655_v60 }
 0x68e   : > { %v1787_v11 = vpop.eup %1786 }
 0x68f   : > { %v1247_v62 = vmul.f32 %v1787_v11, %v1242_v10 }
 0x691   : > { %1637 = vst [vmem:[%s2172_s8 + $0x28] sm:$0xff] %v1247_v62  ;;  %v1261_v4 = vpack.c.bf16 %v1247_v62, %v1247_v62 }
 0x693   : > { %1295 = vmatmul.mubr.bf16.vlgmr.msra.gmra.mrb[40].mxu0 %v1261_v4  ;;  %1336 = vmatmul.mubr.bf16.vlgmr.msra.gmra.mrb[40].mxu1 %v1261_v4  ;;  %v2810_v4 = vld [vmem:[#allocation45_spill] sm:$0xff] }
 0x694   : > { %1381 = vmatpush1.bf16.msra.mxu0 %v2594_v49  ;;  %1422 = vmatpush1.bf16.msra.mxu1 %v2597_v53  ;;  %v1837_v49 = vld [vmem:[#allocation3 + $0xf8] sm:$0xff]  ;;  %v1838_v53 = vld [vmem:[#allocation3 + $0xe0] sm:$0xff] }
 0x695   : > { %1382 = vmatprep.subr.bf16.mxu0 %v2600_v0  ;;  %1423 = vmatprep.subr.bf16.mxu1 %v2603_v2  ;;  %v1839_v0 = vld [vmem:[#allocation3 + $0xf0] sm:$0xff] }
 0x696   : > { %1412 = vmatprep.mubr.bf16.mxu0 %v2789_v54  ;;  %1453 = vmatprep.mubr.bf16.mxu1 %v2789_v54  ;;  %v1824_v54 = vld [vmem:[#allocation3 + $0x88] sm:$0xff] }
 0x698   : > { %1383 = vmatpush1.bf16.msra.mxu0 %v2608_v8  ;;  %1424 = vmatpush1.bf16.msra.mxu1 %v2611_v21  ;;  %v2803_v21 = vld [vmem:[#allocation38_spill] sm:$0xff] }
 0x699   : > { %1384 = vmatprep.subr.bf16.mxu0 %v2614_v56  ;;  %1425 = vmatprep.subr.bf16.mxu1 %v2617_v55  ;;  %v2804_v55 = vld [vmem:[#allocation39_spill] sm:$0xff] }
 0x69c   : > { %1385 = vmatpush1.bf16.msra.mxu0 %v2620_v57  ;;  %1426 = vmatpush1.bf16.msra.mxu1 %v2623_v58 }
 0x69d   : > { %1386 = vmatprep.subr.bf16.mxu0 %v2626_v13  ;;  %1427 = vmatprep.subr.bf16.mxu1 %v2629_v14  ;;  %v2805_v14 = vld [vmem:[#allocation40_spill] sm:$0xff] }
 0x6a0   : > { %1387 = vmatpush1.bf16.msra.mxu0 %v1822_v39  ;;  %1428 = vmatpush1.bf16.msra.mxu1 %v1823_v1 }
 0x6a1   : > { %1388 = vmatprep.subr.bf16.mxu0 %v1824_v54  ;;  %1429 = vmatprep.subr.bf16.mxu1 %v1825_v3 }
 0x6a4   : > { %1389 = vmatpush1.bf16.msra.mxu0 %v1826_v50  ;;  %1430 = vmatpush1.bf16.msra.mxu1 %v1827_v48 }
 0x6a5   : > { %1390 = vmatprep.subr.bf16.mxu0 %v1828_v12  ;;  %1431 = vmatprep.subr.bf16.mxu1 %v1829_v30 }
 0x6a8   : > { %1391 = vmatpush1.bf16.msra.mxu0 %v1830_v5  ;;  %1432 = vmatpush1.bf16.msra.mxu1 %v1831_v52 }
 0x6a9   : > { %1392 = vmatprep.subr.bf16.mxu0 %v1832_v44  ;;  %1433 = vmatprep.subr.bf16.mxu1 %v1833_v6 }
 0x6ac   : > { %1393 = vmatpush1.bf16.msra.mxu0 %v1834_v63  ;;  %1434 = vmatpush1.bf16.msra.mxu1 %v1835_v51 }
 0x6ad   : > { %1394 = vmatprep.subr.bf16.mxu0 %v1836_v47  ;;  %1435 = vmatprep.subr.bf16.mxu1 %v1837_v49 }
 0x6b0   : > { %1395 = vmatpush1.bf16.msra.mxu0 %v1838_v53  ;;  %1436 = vmatpush1.bf16.msra.mxu1 %v1839_v0 }
 0x766   : > { %v1296_v2 = vpop.f32.mrb[40].mxu0  ;;  %v1337_v8 = vpop.f32.mrb[40].mxu1 }
 0x767   : > { %v1344_v56 = vadd.f32 %v1296_v2, %v2803_v21  ;;  %v1346_v57 = vadd.f32 %v1337_v8, %v2804_v55  ;;  %v1298_v58 = vpop.f32.mrb[41].mxu0  ;;  %v1339_v13 = vpop.f32.mrb[41].mxu1 }
 0x768   : > { %v1345_v26 = vadd.f32 %v1298_v58, %v2805_v14  ;;  %v1347_v28 = vadd.f32 %v1339_v13, %v2806_v27  ;;  %v1300_v29 = vpop.f32.mrb[42].mxu0  ;;  %v1341_v31 = vpop.f32.mrb[42].mxu1 }
 0x769   : > { %v1348_v32 = vmul.f32 0.5, %v1344_v56  ;;  %v1301_v33 = vpop.f32.mrb[43].mxu0  ;;  %v1342_v34 = vpop.f32.mrb[43].mxu1 }
 0x76a   : > { %v1352_v35 = vmul.f32 0.5, %v1345_v26  ;;  %v1357_v36 = vmul.f32 0.5, %v1347_v28 }
 0x76b   : > { %1788 = vtanh.f32 %v1348_v32 }
 0x76c   : > { %1790 = vtanh.f32 %v1352_v35 }
 0x76d   : > { %1792 = vtanh.f32 %v1346_v57 }
 0x76e   : > { %1794 = vtanh.f32 %v1357_v36 }
 0x775   : > { %v1789_v37 = vpop.eup %1788 }
 0x776   : > { %v1791_v38 = vpop.eup %1790  ;;  %v1350_v40 = vadd.f32 1.0, %v1789_v37 }
 0x777   : > { %v1354_v41 = vadd.f32 1.0, %v1791_v38  ;;  %v1793_v43 = vpop.eup %1792 }
 0x778   : > { %v1351_v42 = vmul.f32 0.5, %v1350_v40  ;;  %v1795_v17 = vpop.eup %1794 }
 0x779   : > { %v1355_v45 = vmul.f32 0.5, %v1354_v41  ;;  %v1359_v18 = vadd.f32 1.0, %v1795_v17 }
 0x77a   : > { %v1362_v46 = vmul.f32 %v1793_v43, %v1351_v42 }
 0x77b   : > { %v1361_v15 = vmul.f32 %v1355_v45, %v2655_v60  ;;  %v1360_v19 = vmul.f32 0.5, %v1359_v18  ;;  %v2809_v60 = vld [vmem:[#allocation44_spill] sm:$0xff] }
 0x77d   : > { %v1363_v16 = vadd.f32 %v1362_v46, %v1361_v15 }
 0x77f   : > { %1796 = vtanh.f32 %v1363_v16 }
 0x789   : > { %v1797_v20 = vpop.eup %1796 }
 0x78a   : > { %v1365_v22 = vmul.f32 %v1797_v20, %v1360_v19 }
 0x78c   : > { %1638 = vst [vmem:[%s2172_s8 + $0x30] sm:$0xff] %v1365_v22  ;;  %v1379_v23 = vpack.c.bf16 %v1365_v22, %v1365_v22 }
 0x78e   : > { %1413 = vmatmul.mubr.bf16.vlgmr.msra.gmra.mrb[44].mxu0 %v1379_v23  ;;  %1454 = vmatmul.mubr.bf16.vlgmr.msra.gmra.mrb[44].mxu1 %v1379_v23 }
 0x861   : > { %v1414_v24 = vpop.f32.mrb[44].mxu0  ;;  %v1455_v25 = vpop.f32.mrb[44].mxu1 }
 0x862   : > { %v1462_v59 = vadd.f32 %v1414_v24, %v2807_v7  ;;  %v1464_v61 = vadd.f32 %v1455_v25, %v2808_v9  ;;  %v1416_v10 = vpop.f32.mrb[45].mxu0  ;;  %v1457_v11 = vpop.f32.mrb[45].mxu1 }
 0x863   : > { %v1463_v62 = vadd.f32 %v1416_v10, %v2809_v60  ;;  %v1465_v39 = vadd.f32 %v1457_v11, %v2810_v4  ;;  %v1418_v1 = vpop.f32.mrb[46].mxu0  ;;  %v1459_v54 = vpop.f32.mrb[46].mxu1 }
 0x864   : > { %v1466_v3 = vmul.f32 0.5, %v1462_v59  ;;  %v1419_v50 = vpop.f32.mrb[47].mxu0  ;;  %v1460_v48 = vpop.f32.mrb[47].mxu1 }
 0x865   : > { %v1470_v12 = vmul.f32 0.5, %v1463_v62  ;;  %v1475_v30 = vmul.f32 0.5, %v1465_v39 }
 0x866   : > { %1798 = vtanh.f32 %v1466_v3 }
 0x867   : > { %1800 = vtanh.f32 %v1470_v12 }
 0x868   : > { %1802 = vtanh.f32 %v1464_v61 }
 0x869   : > { %1804 = vtanh.f32 %v1475_v30 }
 0x870   : > { %v1799_v5 = vpop.eup %1798 }
 0x871   : > { %v1801_v52 = vpop.eup %1800  ;;  %v1468_v44 = vadd.f32 1.0, %v1799_v5 }
 0x872   : > { %v1472_v6 = vadd.f32 1.0, %v1801_v52  ;;  %v1803_v51 = vpop.eup %1802 }
 0x873   : > { %v1469_v63 = vmul.f32 0.5, %v1468_v44  ;;  %v1805_v2 = vpop.eup %1804 }
 0x874   : > { %v1473_v47 = vmul.f32 0.5, %v1472_v6  ;;  %v1477_v8 = vadd.f32 1.0, %v1805_v2 }
 0x875   : > { %v1480_v49 = vmul.f32 %v1803_v51, %v1469_v63 }
 0x876   : > { %v1479_v53 = vmul.f32 %v1473_v47, %v1363_v16  ;;  %v1478_v21 = vmul.f32 0.5, %v1477_v8 }
 0x878   : > { %v1481_v0 = vadd.f32 %v1480_v49, %v1479_v53 }
 0x87a   : > { %1806 = vtanh.f32 %v1481_v0  ;;  %1485 = vst [vmem:[#allocation6] sm:$0xff] %v1481_v0 }
 0x884   : > { %v1807_v56 = vpop.eup %1806 }
 0x885   : > { %v1483_v55 = vmul.f32 %v1807_v56, %v1478_v21 }
 0x887   : > { %1484 = vst [vmem:[#allocation5] sm:$0xff] %v1483_v55  ;;  %1639 = vst [vmem:[%s2172_s8 + $0x38] sm:$0xff] %v1483_v55 }
 0x888   : > { %1911 = shalt.err (!%p1908_p2)
}
 0x889   : > { %s1912_s8 = scalar_lea.hbm %s2688_s25, 1024  ;;  %s1916_s14 = scalar_lea.hbm %s2739_s4, 2048 }
 0x88a   : > { %p1913_p3 = scmp.ne.s32.totalorder %s2688_s25, %s1912_s8  ;;  %p1917_p12 = scmp.lt.u32.totalorder %s2688_s25, %s2739_s4 }
 0x88b   : > { %p1918_p8 = scmp.lt.u32.totalorder %s1916_s14, %s1912_s8  ;;  %p1920_p9 = scmp.lt.u32.totalorder %s1912_s8, %s2688_s25 }
 0x88c   : > { %p1914_p6 = pnand %p1913_p3, %p2811_p10 }
 0x88d   : > { %p1919_p4 = por %p1918_p8, %p1917_p12 }
 0x88e   : > { %p1915_p1 = pneg %p1914_p6 }
 0x88f   : > { %p1921_p5 = por %p1920_p9, %p1919_p4 }
 0x891   : > { %p1922_p0 = pnand %p1921_p5, %p1915_p1 }
 0x893   : > { %1925 = shalt.err (!%p1922_p0)
}
 0x894   : > { %s1993_s23 = smov 128   ;;  %s1994_s29 = smov 8  }
 0x895   : > { %1655 = dma.vmem_to_hbm [thread:$0]  (%p2811_p10), %s2690_s1, 1024, %s2688_s25, %s1489_s6, %s1993_s23, %s1993_s23, %s1994_s29  }
 0x896 PF: > { %s1517_s20 = sand.u32 1, %s1960_s15   ;;  %p2812_p7 = scmp.ne.s32.totalorder %s2755_s28, 0 }
 0x897   : > { %p2813_p11 = scmp.ge.s32.totalorder %s1972_s18, 2  ;;  %s1518_s12 = scalar_lea.sflag [#allocation10], %s1517_s20 }
 0x899   : > { %p1666_p13 = pnand %p2813_p11, %p2812_p7 }
 0x89b   : > { %1955 = dma.done.wait (!%p1666_p13), %s1518_s12, 1024  }
 0x89c   : > { %1957 = vsyncadd (!%p1666_p13), %s1518_s12, 4294966272  ;;  %s2814_s10 = sld [smem:[#allocation23_spill]]  ;;  %s2815_s17 = sld [smem:[#allocation24_spill]] }
 0x89d   : > { %p18_p2 = scmp.ge.s32.totalorder %s2045_s21, 4   ;;  %s2816_s15 = smov %s1964_s16 }
 0x89e   : > { %s2818_s18 = smov %s2045_s21 }
 0x89f   :  { %20 = sbr.rel (!%p18_p2) target bundleno = 9 (0x9), region = 114 }
 0x8a2   : > { %s2817_s16 = smov %s2814_s10 }
 0x8a6   :  { %1523 = vsyncpa [#allocation9], 1 }
 0x8a7   :  { %1525 = vsyncpa [#allocation9 + $0x1], 1 }
 0x8a8   :  { %1526 = vsyncpa [#allocation12], 1 }
 0x8a9   :  { %1527 = vsyncpa [#allocation10], 1 }
 0x8aa   :  { %1529 = vsyncpa [#allocation10 + $0x1], 1 }
 0x8ab   :  { %1530 = vsyncmov [#allocation7] }
 0x8ae   :  { %s1531_s18 = vpop.sfrf %1530 }
 0x8af   :  { %p1645_p10 = scmp.ne.s32.totalorder %s1531_s18, 0 }
 0x8b1   :  { %1535 = shalt.err (%p1645_p10)  }
 0x8b2   :  { %1537 = vsyncmov [#allocation7 + $0x1] }
 0x8b5   :  { %s1538_s27 = vpop.sfrf %1537 }
 0x8b6   :  { %p1646_p3 = scmp.ne.s32.totalorder %s1538_s27, 0 }
 0x8b8   :  { %1542 = shalt.err (%p1646_p3)  }

</bundles_post_ra>
